<compile_context>
chip_gen: v7x
topology: tpu7x:2x2x1
jax: 0.10.0
libtpu: 0.0.40
codegen_flags: <defaults>
</compile_context>

<pallas_src>
import functools
import math

import jax
import jax.numpy as jnp
from jax.experimental import pallas as pl
from jax.experimental.pallas import tpu as pltpu


def _round_up(a, m):
    return -(-a // m) * m


def _vmem_limit_bytes():
    cap = 64 * 1024 * 1024  # conservative fallback (v7x physical VMEM)
    try:
        cap = int(getattr(pltpu.get_tpu_info(), "vmem_capacity_bytes", cap))
    except Exception:
        pass
    # leave headroom for double-buffering; never exceed 64 MiB request
    return int(min(cap * 3 // 4, 64 * 1024 * 1024))


_VMEM_LIMIT = _vmem_limit_bytes()


# ----------------------------------------------------------------------------
# Pallas kernel: one (group, batch, time-tile) step of grouped Conv1d
#                + bias + leaky_relu, time on the lane axis.
# ----------------------------------------------------------------------------
def _grouped_conv_tile_kernel(x_ref, w_ref, b_ref, o_ref, *, K, S, TL, slope):
    # x_ref: (1, 1, S, Cin_g, TW)   polyphase input window (bf16)
    # w_ref: (1, K, Cout_g, Cin_g)  per-group weights, tap-major (bf16)
    # b_ref: (1, Cout_g, 1)         per-group bias (f32)
    # o_ref: (1, 1, Cout_g, TL)     output tile, time on lanes (f32)
    cout_g = w_ref.shape[2]
    acc = jnp.zeros((cout_g, TL), jnp.float32)
    # K-tap reduction stays inside the kernel (no im2col in HBM).
    for k in range(K):
        q, p = divmod(k, S)
        xs = x_ref[0, 0, p, :, pl.ds(q, TL)]      # (Cin_g, TL) static slice
        wk = w_ref[0, k]                          # (Cout_g, Cin_g)
        acc = acc + jnp.dot(wk, xs, preferred_element_type=jnp.float32)
    acc = acc + b_ref[0]                          # (Cout_g, 1) broadcasts over lanes
    o_ref[0, 0] = jnp.where(acc >= 0.0, acc, slope * acc)


def conv1d_lrelu(x, w, b, *, stride, padding, groups, slope=0.1):
    """Grouped Conv1d (PyTorch NCL semantics) + leaky_relu.

    x: (B, Cin, L) f32, w: (Cout, Cin/groups, K), b: (Cout,) -> (B, Cout, L_out) f32
    """
    B, Cin, L = x.shape
    Cout, Cin_g, K = w.shape
    G = groups
    Cout_g = Cout // G
    S = stride
    L_out = (L + 2 * padding - K) // S + 1
    H = (K - 1) // S                      # halo along the polyphase time axis

    cin_g_p = max(Cin_g, 8)               # pad tiny channel counts to one sublane
    cout_g_p = max(Cout_g, 8)

    # Output time tile (lane axis): multiple of 128, capped so the f32
    # accumulator tile stays small for the very wide layers.
    TL = min(512, _round_up(L_out, 128))
    while TL > 128 and cout_g_p * TL * 4 > (2 << 20):
        TL //= 2
    Lo_p = _round_up(L_out, TL)
    n_t = Lo_p // TL
    TW = TL + H

    # -------- glue: zero-pad + polyphase + overlapping windows (pure JAX) ----
    if cin_g_p != Cin_g:
        assert G == 1, "sub-sublane Cin_g only expected for the ungrouped stem"
        x = jnp.pad(x, ((0, 0), (0, cin_g_p - Cin_g), (0, 0)))
    Cin_p = G * cin_g_p

    L_ext = (Lo_p + H) * S
    right = L_ext - L - padding
    assert right >= 0
    x_ext = jnp.pad(x, ((0, 0), (0, 0), (padding, right))).astype(jnp.bfloat16)
    xp = x_ext.reshape(B, Cin_p, Lo_p + H, S)        # [b,c,u,p] = x_ext[b,c,u*S+p]
    win = jnp.arange(n_t)[:, None] * TL + jnp.arange(TW)[None, :]   # (n_t, TW)
    x_win = xp[:, :, win, :]                         # (B, Cin_p, n_t, TW, S)
    x_win = jnp.transpose(x_win, (0, 2, 4, 1, 3))    # (B, n_t, S, Cin_p, TW)

    # Weights: (Cout, Cin_g, K) -> (G, K, Cout_g, Cin_g) bf16; bias -> (G, Cout_g, 1)
    wg = w.reshape(G, Cout_g, Cin_g, K)
    if cout_g_p != Cout_g:
        wg = jnp.pad(wg, ((0, 0), (0, cout_g_p - Cout_g), (0, 0), (0, 0)))
    if cin_g_p != Cin_g:
        wg = jnp.pad(wg, ((0, 0), (0, 0), (0, cin_g_p - Cin_g), (0, 0)))
    wg = jnp.transpose(wg, (0, 3, 1, 2)).astype(jnp.bfloat16)

    bg = b.reshape(G, Cout_g)
    if cout_g_p != Cout_g:
        bg = jnp.pad(bg, ((0, 0), (0, cout_g_p - Cout_g)))
    bg = bg.reshape(G, cout_g_p, 1).astype(jnp.float32)

    # -------- hot path: Pallas tiled grouped conv + bias + leaky_relu --------
    kernel = functools.partial(_grouped_conv_tile_kernel, K=K, S=S, TL=TL, slope=slope)
    out = pl.pallas_call(
        kernel,
        out_shape=jax.ShapeDtypeStruct((B, G, cout_g_p, Lo_p), jnp.float32),
        grid=(G, B, n_t),
        in_specs=[
            # polyphase windows: change every step -> pipelined
            pl.BlockSpec((1, 1, S, cin_g_p, TW), lambda g, bb, m: (bb, m, 0, g, 0)),
            # weights / bias: index_map ignores (bb, m) -> resident across inner axes
            pl.BlockSpec((1, K, cout_g_p, cin_g_p), lambda g, bb, m: (g, 0, 0, 0)),
            pl.BlockSpec((1, cout_g_p, 1), lambda g, bb, m: (g, 0, 0)),
        ],
        out_specs=pl.BlockSpec((1, 1, cout_g_p, TL), lambda g, bb, m: (bb, g, 0, m)),
        compiler_params=pltpu.CompilerParams(
            dimension_semantics=("parallel", "parallel", "parallel"),
            vmem_limit_bytes=_VMEM_LIMIT,
        ),
    )(x_win, wg, bg)

    # drop channel/time padding; layout is already NCL (no transpose needed)
    y = out[:, :, :Cout_g, :L_out].reshape(B, Cout, L_out)
    return y
    # TODO(synk): fold (G, B) into one grid axis / batch the per-group matmuls when
    # L_out is tiny (late layers) to cut per-step grid overhead further.


# ----------------------------------------------------------------------------
# AvgPool1d(kernel=4, stride=2, padding=2), count_include_pad=True (PyTorch default)
# ----------------------------------------------------------------------------
def avg_pool1d(x, kernel=4, stride=2, padding=2):
    B, C, L = x.shape
    L_out = (L + 2 * padding - kernel) // stride + 1
    x_pad = jnp.pad(x, ((0, 0), (0, 0), (padding, padding)))
    pos = (jnp.arange(L_out) * stride)[:, None] + jnp.arange(kernel)[None, :]
    return x_pad[:, :, pos].sum(-1) / float(kernel)


# ----------------------------------------------------------------------------
# Parameter setup (deterministic, synthetic)
# ----------------------------------------------------------------------------
# (Cin, Cout, K, stride, groups, padding) for each DS layer
LAYER_CFG = [
    (1, 128, 15, 1, 1, 7),
    (128, 128, 41, 2, 4, 20),
    (128, 256, 41, 2, 16, 20),
    (256, 512, 41, 4, 16, 20),
    (512, 1024, 41, 4, 16, 20),
    (1024, 1024, 41, 1, 16, 20),
    (1024, 1024, 5, 1, 1, 2),
    (1024, 1, 3, 1, 1, 1),
]


def _spectral_normalize(w, n_iters=20):
    """Deterministic spectral normalization (divide by largest singular value)."""
    cout = w.shape[0]
    w_mat = w.reshape(cout, -1)
    v = jnp.ones((w_mat.shape[1],), jnp.float32) / jnp.sqrt(
        jnp.asarray(w_mat.shape[1], jnp.float32))
    u = None
    for _ in range(n_iters):
        u = w_mat @ v
        u = u / (jnp.linalg.norm(u) + 1e-12)
        v = w_mat.T @ u
        v = v / (jnp.linalg.norm(v) + 1e-12)
    sigma = u @ (w_mat @ v)
    return w / sigma


def init_ds_params(key, use_spectral_norm):
    params = []
    for (cin, cout, k, _s, g, _p) in LAYER_CFG:
        cin_g = cin // g
        key, kw, kb = jax.random.split(key, 3)
        fan_in = cin_g * k
        bound = 1.0 / math.sqrt(fan_in)
        w = jax.random.uniform(kw, (cout, cin_g, k), jnp.float32, -bound, bound)
        b = jax.random.uniform(kb, (cout,), jnp.float32, -bound, bound)
        if use_spectral_norm:
            w = _spectral_normalize(w)
        # weight_norm at init is an identity re-parameterization -> no change.
        params.append((w, b))
    return params, key


# ----------------------------------------------------------------------------
# DS / MSD forward (mirrors the PyTorch modules; .cpu() calls are no-ops here)
# ----------------------------------------------------------------------------
def ds_forward(params, x, leaky_slope=0.1):
    fmaps = []
    for (w, b), (_cin, _cout, _k, s, g, p) in zip(params, LAYER_CFG):
        x = conv1d_lrelu(x, w, b, stride=s, padding=p, groups=g, slope=leaky_slope)
        fmaps.append(x)
    out = x.reshape(x.shape[0], -1)  # flatten(x, 1, -1)
    return out, fmaps


def msd_forward(all_params, x):
    outs, fmaps = [], []
    for i in range(len(all_params)):
        if i != 0:
            x = avg_pool1d(x, kernel=4, stride=2, padding=2)
        o, f = ds_forward(all_params[i], x)
        outs.append(o)
        fmaps.append(f)
    return outs, fmaps


# ----------------------------------------------------------------------------
if __name__ == "__main__":
    key = jax.random.PRNGKey(0)

    # three discriminators: [spectral_norm, weight_norm, weight_norm]
    all_params = []
    for i in range(3):
        p, key = init_ds_params(key, use_spectral_norm=(i == 0))
        all_params.append(p)

    key, kx = jax.random.split(key)
    # input: (batch, 1, time) raw waveform, small sequence length
    x = jax.random.normal(kx, (2, 1, 256), jnp.float32)

    outs, fmaps = msd_forward(all_params, x)

    for o in outs:
        jax.block_until_ready(o)
    for f_list in fmaps:
        for f in f_list:
            jax.block_until_ready(f)

    print("KERNEL_OK")
</pallas_src>

<mosaic_0001>
module attributes {stable_mosaic.version = 11 : i64} {
  func.func @_grouped_conv_tile_kernel(%arg0: i32, %arg1: i32, %arg2: i32, %arg3: memref<1x1x1x8x270xbf16, #tpu.memory_space<vmem>>, %arg4: memref<1x15x128x8xbf16, #tpu.memory_space<vmem>>, %arg5: memref<1x128x1xf32, #tpu.memory_space<vmem>>, %arg6: memref<1x1x128x256xf32, #tpu.memory_space<vmem>>) attributes {dimension_semantics = [#tpu.dimension_semantics<parallel>, #tpu.dimension_semantics<parallel>, #tpu.dimension_semantics<parallel>], iteration_bounds = array<i64: 1, 2, 1>, scalar_prefetch = 0 : i64, scratch_operands = 0 : i64, tpu.core_type = #tpu.core_type<tc>, window_params = [{transform_indices = @transform_0, window_bounds = array<i64: 1, 1, 1, 8, 270>}, {transform_indices = @transform_1, window_bounds = array<i64: 1, 15, 128, 8>}, {transform_indices = @transform_2, window_bounds = array<i64: 1, 128, 1>}, {transform_indices = @transform_3, window_bounds = array<i64: 1, 1, 128, 256>}]} {
    %cst = arith.constant 0.000000e+00 : f32
    %0 = vector.broadcast %cst : f32 to vector<128x256xf32>
    %c0 = arith.constant 0 : index
    %c0_0 = arith.constant 0 : index
    %c0_1 = arith.constant 0 : index
    %c0_2 = arith.constant 0 : index
    %c0_3 = arith.constant 0 : index
    %1 = vector.load %arg3[%c0, %c0_0, %c0_1, %c0_2, %c0_3] : memref<1x1x1x8x270xbf16, #tpu.memory_space<vmem>>, vector<1x1x1x8x256xbf16>
    %2 = vector.shape_cast %1 : vector<1x1x1x8x256xbf16> to vector<8x256xbf16>
    %c0_4 = arith.constant 0 : index
    %c0_5 = arith.constant 0 : index
    %c0_6 = arith.constant 0 : index
    %c0_7 = arith.constant 0 : index
    %3 = vector.load %arg4[%c0_4, %c0_5, %c0_6, %c0_7] : memref<1x15x128x8xbf16, #tpu.memory_space<vmem>>, vector<1x1x128x8xbf16>
    %4 = vector.shape_cast %3 : vector<1x1x128x8xbf16> to vector<128x8xbf16>
    %cst_8 = arith.constant dense<0.000000e+00> : vector<128x256xf32>
    %5 = tpu.matmul %4, %2, %cst_8 {dimension_numbers = #tpu.dot_dimension_numbers<[1], [0], [0], [1], [0, 0, 1, 1], [], []>} : vector<128x8xbf16>, vector<8x256xbf16>, vector<128x256xf32> -> vector<128x256xf32>
    %6 = arith.addf %0, %5 : vector<128x256xf32>
    %c0_9 = arith.constant 0 : index
    %c0_10 = arith.constant 0 : index
    %c0_11 = arith.constant 0 : index
    %c0_12 = arith.constant 0 : index
    %c1 = arith.constant 1 : index
    %7 = vector.load %arg3[%c0_9, %c0_10, %c0_11, %c0_12, %c1] : memref<1x1x1x8x270xbf16, #tpu.memory_space<vmem>>, vector<1x1x1x8x256xbf16>
    %8 = vector.shape_cast %7 : vector<1x1x1x8x256xbf16> to vector<8x256xbf16>
    %c0_13 = arith.constant 0 : index
    %c1_14 = arith.constant 1 : index
    %c0_15 = arith.constant 0 : index
    %c0_16 = arith.constant 0 : index
    %9 = vector.load %arg4[%c0_13, %c1_14, %c0_15, %c0_16] : memref<1x15x128x8xbf16, #tpu.memory_space<vmem>>, vector<1x1x128x8xbf16>
    %10 = vector.shape_cast %9 : vector<1x1x128x8xbf16> to vector<128x8xbf16>
    %cst_17 = arith.constant dense<0.000000e+00> : vector<128x256xf32>
    %11 = tpu.matmul %10, %8, %cst_17 {dimension_numbers = #tpu.dot_dimension_numbers<[1], [0], [0], [1], [0, 0, 1, 1], [], []>} : vector<128x8xbf16>, vector<8x256xbf16>, vector<128x256xf32> -> vector<128x256xf32>
    %12 = arith.addf %6, %11 : vector<128x256xf32>
    %c0_18 = arith.constant 0 : index
    %c0_19 = arith.constant 0 : index
    %c0_20 = arith.constant 0 : index
    %c0_21 = arith.constant 0 : index
    %c2 = arith.constant 2 : index
    %13 = vector.load %arg3[%c0_18, %c0_19, %c0_20, %c0_21, %c2] : memref<1x1x1x8x270xbf16, #tpu.memory_space<vmem>>, vector<1x1x1x8x256xbf16>
    %14 = vector.shape_cast %13 : vector<1x1x1x8x256xbf16> to vector<8x256xbf16>
    %c0_22 = arith.constant 0 : index
    %c2_23 = arith.constant 2 : index
    %c0_24 = arith.constant 0 : index
    %c0_25 = arith.constant 0 : index
    %15 = vector.load %arg4[%c0_22, %c2_23, %c0_24, %c0_25] : memref<1x15x128x8xbf16, #tpu.memory_space<vmem>>, vector<1x1x128x8xbf16>
    %16 = vector.shape_cast %15 : vector<1x1x128x8xbf16> to vector<128x8xbf16>
    %cst_26 = arith.constant dense<0.000000e+00> : vector<128x256xf32>
    %17 = tpu.matmul %16, %14, %cst_26 {dimension_numbers = #tpu.dot_dimension_numbers<[1], [0], [0], [1], [0, 0, 1, 1], [], []>} : vector<128x8xbf16>, vector<8x256xbf16>, vector<128x256xf32> -> vector<128x256xf32>
    %18 = arith.addf %12, %17 : vector<128x256xf32>
    %c0_27 = arith.constant 0 : index
    %c0_28 = arith.constant 0 : index
    %c0_29 = arith.constant 0 : index
    %c0_30 = arith.constant 0 : index
    %c3 = arith.constant 3 : index
    %19 = vector.load %arg3[%c0_27, %c0_28, %c0_29, %c0_30, %c3] : memref<1x1x1x8x270xbf16, #tpu.memory_space<vmem>>, vector<1x1x1x8x256xbf16>
    %20 = vector.shape_cast %19 : vector<1x1x1x8x256xbf16> to vector<8x256xbf16>
    %c0_31 = arith.constant 0 : index
    %c3_32 = arith.constant 3 : index
    %c0_33 = arith.constant 0 : index
    %c0_34 = arith.constant 0 : index
    %21 = vector.load %arg4[%c0_31, %c3_32, %c0_33, %c0_34] : memref<1x15x128x8xbf16, #tpu.memory_space<vmem>>, vector<1x1x128x8xbf16>
    %22 = vector.shape_cast %21 : vector<1x1x128x8xbf16> to vector<128x8xbf16>
    %cst_35 = arith.constant dense<0.000000e+00> : vector<128x256xf32>
    %23 = tpu.matmul %22, %20, %cst_35 {dimension_numbers = #tpu.dot_dimension_numbers<[1], [0], [0], [1], [0, 0, 1, 1], [], []>} : vector<128x8xbf16>, vector<8x256xbf16>, vector<128x256xf32> -> vector<128x256xf32>
    %24 = arith.addf %18, %23 : vector<128x256xf32>
    %c0_36 = arith.constant 0 : index
    %c0_37 = arith.constant 0 : index
    %c0_38 = arith.constant 0 : index
    %c0_39 = arith.constant 0 : index
    %c4 = arith.constant 4 : index
    %25 = vector.load %arg3[%c0_36, %c0_37, %c0_38, %c0_39, %c4] : memref<1x1x1x8x270xbf16, #tpu.memory_space<vmem>>, vector<1x1x1x8x256xbf16>
    %26 = vector.shape_cast %25 : vector<1x1x1x8x256xbf16> to vector<8x256xbf16>
    %c0_40 = arith.constant 0 : index
    %c4_41 = arith.constant 4 : index
    %c0_42 = arith.constant 0 : index
    %c0_43 = arith.constant 0 : index
    %27 = vector.load %arg4[%c0_40, %c4_41, %c0_42, %c0_43] : memref<1x15x128x8xbf16, #tpu.memory_space<vmem>>, vector<1x1x128x8xbf16>
    %28 = vector.shape_cast %27 : vector<1x1x128x8xbf16> to vector<128x8xbf16>
    %cst_44 = arith.constant dense<0.000000e+00> : vector<128x256xf32>
    %29 = tpu.matmul %28, %26, %cst_44 {dimension_numbers = #tpu.dot_dimension_numbers<[1], [0], [0], [1], [0, 0, 1, 1], [], []>} : vector<128x8xbf16>, vector<8x256xbf16>, vector<128x256xf32> -> vector<128x256xf32>
    %30 = arith.addf %24, %29 : vector<128x256xf32>
    %c0_45 = arith.constant 0 : index
    %c0_46 = arith.constant 0 : index
    %c0_47 = arith.constant 0 : index
    %c0_48 = arith.constant 0 : index
    %c5 = arith.constant 5 : index
    %31 = vector.load %arg3[%c0_45, %c0_46, %c0_47, %c0_48, %c5] : memref<1x1x1x8x270xbf16, #tpu.memory_space<vmem>>, vector<1x1x1x8x256xbf16>
    %32 = vector.shape_cast %31 : vector<1x1x1x8x256xbf16> to vector<8x256xbf16>
    %c0_49 = arith.constant 0 : index
    %c5_50 = arith.constant 5 : index
    %c0_51 = arith.constant 0 : index
    %c0_52 = arith.constant 0 : index
    %33 = vector.load %arg4[%c0_49, %c5_50, %c0_51, %c0_52] : memref<1x15x128x8xbf16, #tpu.memory_space<vmem>>, vector<1x1x128x8xbf16>
    %34 = vector.shape_cast %33 : vector<1x1x128x8xbf16> to vector<128x8xbf16>
    %cst_53 = arith.constant dense<0.000000e+00> : vector<128x256xf32>
    %35 = tpu.matmul %34, %32, %cst_53 {dimension_numbers = #tpu.dot_dimension_numbers<[1], [0], [0], [1], [0, 0, 1, 1], [], []>} : vector<128x8xbf16>, vector<8x256xbf16>, vector<128x256xf32> -> vector<128x256xf32>
    %36 = arith.addf %30, %35 : vector<128x256xf32>
    %c0_54 = arith.constant 0 : index
    %c0_55 = arith.constant 0 : index
    %c0_56 = arith.constant 0 : index
    %c0_57 = arith.constant 0 : index
    %c6 = arith.constant 6 : index
    %37 = vector.load %arg3[%c0_54, %c0_55, %c0_56, %c0_57, %c6] : memref<1x1x1x8x270xbf16, #tpu.memory_space<vmem>>, vector<1x1x1x8x256xbf16>
    %38 = vector.shape_cast %37 : vector<1x1x1x8x256xbf16> to vector<8x256xbf16>
    %c0_58 = arith.constant 0 : index
    %c6_59 = arith.constant 6 : index
    %c0_60 = arith.constant 0 : index
    %c0_61 = arith.constant 0 : index
    %39 = vector.load %arg4[%c0_58, %c6_59, %c0_60, %c0_61] : memref<1x15x128x8xbf16, #tpu.memory_space<vmem>>, vector<1x1x128x8xbf16>
    %40 = vector.shape_cast %39 : vector<1x1x128x8xbf16> to vector<128x8xbf16>
    %cst_62 = arith.constant dense<0.000000e+00> : vector<128x256xf32>
    %41 = tpu.matmul %40, %38, %cst_62 {dimension_numbers = #tpu.dot_dimension_numbers<[1], [0], [0], [1], [0, 0, 1, 1], [], []>} : vector<128x8xbf16>, vector<8x256xbf16>, vector<128x256xf32> -> vector<128x256xf32>
    %42 = arith.addf %36, %41 : vector<128x256xf32>
    %c0_63 = arith.constant 0 : index
    %c0_64 = arith.constant 0 : index
    %c0_65 = arith.constant 0 : index
    %c0_66 = arith.constant 0 : index
    %c7 = arith.constant 7 : index
    %43 = vector.load %arg3[%c0_63, %c0_64, %c0_65, %c0_66, %c7] : memref<1x1x1x8x270xbf16, #tpu.memory_space<vmem>>, vector<1x1x1x8x256xbf16>
    %44 = vector.shape_cast %43 : vector<1x1x1x8x256xbf16> to vector<8x256xbf16>
    %c0_67 = arith.constant 0 : index
    %c7_68 = arith.constant 7 : index
    %c0_69 = arith.constant 0 : index
    %c0_70 = arith.constant 0 : index
    %45 = vector.load %arg4[%c0_67, %c7_68, %c0_69, %c0_70] : memref<1x15x128x8xbf16, #tpu.memory_space<vmem>>, vector<1x1x128x8xbf16>
    %46 = vector.shape_cast %45 : vector<1x1x128x8xbf16> to vector<128x8xbf16>
    %cst_71 = arith.constant dense<0.000000e+00> : vector<128x256xf32>
    %47 = tpu.matmul %46, %44, %cst_71 {dimension_numbers = #tpu.dot_dimension_numbers<[1], [0], [0], [1], [0, 0, 1, 1], [], []>} : vector<128x8xbf16>, vector<8x256xbf16>, vector<128x256xf32> -> vector<128x256xf32>
    %48 = arith.addf %42, %47 : vector<128x256xf32>
    %c0_72 = arith.constant 0 : index
    %c0_73 = arith.constant 0 : index
    %c0_74 = arith.constant 0 : index
    %c0_75 = arith.constant 0 : index
    %c8 = arith.constant 8 : index
    %49 = vector.load %arg3[%c0_72, %c0_73, %c0_74, %c0_75, %c8] : memref<1x1x1x8x270xbf16, #tpu.memory_space<vmem>>, vector<1x1x1x8x256xbf16>
    %50 = vector.shape_cast %49 : vector<1x1x1x8x256xbf16> to vector<8x256xbf16>
    %c0_76 = arith.constant 0 : index
    %c8_77 = arith.constant 8 : index
    %c0_78 = arith.constant 0 : index
    %c0_79 = arith.constant 0 : index
    %51 = vector.load %arg4[%c0_76, %c8_77, %c0_78, %c0_79] : memref<1x15x128x8xbf16, #tpu.memory_space<vmem>>, vector<1x1x128x8xbf16>
    %52 = vector.shape_cast %51 : vector<1x1x128x8xbf16> to vector<128x8xbf16>
    %cst_80 = arith.constant dense<0.000000e+00> : vector<128x256xf32>
    %53 = tpu.matmul %52, %50, %cst_80 {dimension_numbers = #tpu.dot_dimension_numbers<[1], [0], [0], [1], [0, 0, 1, 1], [], []>} : vector<128x8xbf16>, vector<8x256xbf16>, vector<128x256xf32> -> vector<128x256xf32>
    %54 = arith.addf %48, %53 : vector<128x256xf32>
    %c0_81 = arith.constant 0 : index
    %c0_82 = arith.constant 0 : index
    %c0_83 = arith.constant 0 : index
    %c0_84 = arith.constant 0 : index
    %c9 = arith.constant 9 : index
    %55 = vector.load %arg3[%c0_81, %c0_82, %c0_83, %c0_84, %c9] : memref<1x1x1x8x270xbf16, #tpu.memory_space<vmem>>, vector<1x1x1x8x256xbf16>
    %56 = vector.shape_cast %55 : vector<1x1x1x8x256xbf16> to vector<8x256xbf16>
    %c0_85 = arith.constant 0 : index
    %c9_86 = arith.constant 9 : index
    %c0_87 = arith.constant 0 : index
    %c0_88 = arith.constant 0 : index
    %57 = vector.load %arg4[%c0_85, %c9_86, %c0_87, %c0_88] : memref<1x15x128x8xbf16, #tpu.memory_space<vmem>>, vector<1x1x128x8xbf16>
    %58 = vector.shape_cast %57 : vector<1x1x128x8xbf16> to vector<128x8xbf16>
    %cst_89 = arith.constant dense<0.000000e+00> : vector<128x256xf32>
    %59 = tpu.matmul %58, %56, %cst_89 {dimension_numbers = #tpu.dot_dimension_numbers<[1], [0], [0], [1], [0, 0, 1, 1], [], []>} : vector<128x8xbf16>, vector<8x256xbf16>, vector<128x256xf32> -> vector<128x256xf32>
    %60 = arith.addf %54, %59 : vector<128x256xf32>
    %c0_90 = arith.constant 0 : index
    %c0_91 = arith.constant 0 : index
    %c0_92 = arith.constant 0 : index
    %c0_93 = arith.constant 0 : index
    %c10 = arith.constant 10 : index
    %61 = vector.load %arg3[%c0_90, %c0_91, %c0_92, %c0_93, %c10] : memref<1x1x1x8x270xbf16, #tpu.memory_space<vmem>>, vector<1x1x1x8x256xbf16>
    %62 = vector.shape_cast %61 : vector<1x1x1x8x256xbf16> to vector<8x256xbf16>
    %c0_94 = arith.constant 0 : index
    %c10_95 = arith.constant 10 : index
    %c0_96 = arith.constant 0 : index
    %c0_97 = arith.constant 0 : index
    %63 = vector.load %arg4[%c0_94, %c10_95, %c0_96, %c0_97] : memref<1x15x128x8xbf16, #tpu.memory_space<vmem>>, vector<1x1x128x8xbf16>
    %64 = vector.shape_cast %63 : vector<1x1x128x8xbf16> to vector<128x8xbf16>
    %cst_98 = arith.constant dense<0.000000e+00> : vector<128x256xf32>
    %65 = tpu.matmul %64, %62, %cst_98 {dimension_numbers = #tpu.dot_dimension_numbers<[1], [0], [0], [1], [0, 0, 1, 1], [], []>} : vector<128x8xbf16>, vector<8x256xbf16>, vector<128x256xf32> -> vector<128x256xf32>
    %66 = arith.addf %60, %65 : vector<128x256xf32>
    %c0_99 = arith.constant 0 : index
    %c0_100 = arith.constant 0 : index
    %c0_101 = arith.constant 0 : index
    %c0_102 = arith.constant 0 : index
    %c11 = arith.constant 11 : index
    %67 = vector.load %arg3[%c0_99, %c0_100, %c0_101, %c0_102, %c11] : memref<1x1x1x8x270xbf16, #tpu.memory_space<vmem>>, vector<1x1x1x8x256xbf16>
    %68 = vector.shape_cast %67 : vector<1x1x1x8x256xbf16> to vector<8x256xbf16>
    %c0_103 = arith.constant 0 : index
    %c11_104 = arith.constant 11 : index
    %c0_105 = arith.constant 0 : index
    %c0_106 = arith.constant 0 : index
    %69 = vector.load %arg4[%c0_103, %c11_104, %c0_105, %c0_106] : memref<1x15x128x8xbf16, #tpu.memory_space<vmem>>, vector<1x1x128x8xbf16>
    %70 = vector.shape_cast %69 : vector<1x1x128x8xbf16> to vector<128x8xbf16>
    %cst_107 = arith.constant dense<0.000000e+00> : vector<128x256xf32>
    %71 = tpu.matmul %70, %68, %cst_107 {dimension_numbers = #tpu.dot_dimension_numbers<[1], [0], [0], [1], [0, 0, 1, 1], [], []>} : vector<128x8xbf16>, vector<8x256xbf16>, vector<128x256xf32> -> vector<128x256xf32>
    %72 = arith.addf %66, %71 : vector<128x256xf32>
    %c0_108 = arith.constant 0 : index
    %c0_109 = arith.constant 0 : index
    %c0_110 = arith.constant 0 : index
    %c0_111 = arith.constant 0 : index
    %c12 = arith.constant 12 : index
    %73 = vector.load %arg3[%c0_108, %c0_109, %c0_110, %c0_111, %c12] : memref<1x1x1x8x270xbf16, #tpu.memory_space<vmem>>, vector<1x1x1x8x256xbf16>
    %74 = vector.shape_cast %73 : vector<1x1x1x8x256xbf16> to vector<8x256xbf16>
    %c0_112 = arith.constant 0 : index
    %c12_113 = arith.constant 12 : index
    %c0_114 = arith.constant 0 : index
    %c0_115 = arith.constant 0 : index
    %75 = vector.load %arg4[%c0_112, %c12_113, %c0_114, %c0_115] : memref<1x15x128x8xbf16, #tpu.memory_space<vmem>>, vector<1x1x128x8xbf16>
    %76 = vector.shape_cast %75 : vector<1x1x128x8xbf16> to vector<128x8xbf16>
    %cst_116 = arith.constant dense<0.000000e+00> : vector<128x256xf32>
    %77 = tpu.matmul %76, %74, %cst_116 {dimension_numbers = #tpu.dot_dimension_numbers<[1], [0], [0], [1], [0, 0, 1, 1], [], []>} : vector<128x8xbf16>, vector<8x256xbf16>, vector<128x256xf32> -> vector<128x256xf32>
    %78 = arith.addf %72, %77 : vector<128x256xf32>
    %c0_117 = arith.constant 0 : index
    %c0_118 = arith.constant 0 : index
    %c0_119 = arith.constant 0 : index
    %c0_120 = arith.constant 0 : index
    %c13 = arith.constant 13 : index
    %79 = vector.load %arg3[%c0_117, %c0_118, %c0_119, %c0_120, %c13] : memref<1x1x1x8x270xbf16, #tpu.memory_space<vmem>>, vector<1x1x1x8x256xbf16>
    %80 = vector.shape_cast %79 : vector<1x1x1x8x256xbf16> to vector<8x256xbf16>
    %c0_121 = arith.constant 0 : index
    %c13_122 = arith.constant 13 : index
    %c0_123 = arith.constant 0 : index
    %c0_124 = arith.constant 0 : index
    %81 = vector.load %arg4[%c0_121, %c13_122, %c0_123, %c0_124] : memref<1x15x128x8xbf16, #tpu.memory_space<vmem>>, vector<1x1x128x8xbf16>
    %82 = vector.shape_cast %81 : vector<1x1x128x8xbf16> to vector<128x8xbf16>
    %cst_125 = arith.constant dense<0.000000e+00> : vector<128x256xf32>
    %83 = tpu.matmul %82, %80, %cst_125 {dimension_numbers = #tpu.dot_dimension_numbers<[1], [0], [0], [1], [0, 0, 1, 1], [], []>} : vector<128x8xbf16>, vector<8x256xbf16>, vector<128x256xf32> -> vector<128x256xf32>
    %84 = arith.addf %78, %83 : vector<128x256xf32>
    %c0_126 = arith.constant 0 : index
    %c0_127 = arith.constant 0 : index
    %c0_128 = arith.constant 0 : index
    %c0_129 = arith.constant 0 : index
    %c14 = arith.constant 14 : index
    %85 = vector.load %arg3[%c0_126, %c0_127, %c0_128, %c0_129, %c14] : memref<1x1x1x8x270xbf16, #tpu.memory_space<vmem>>, vector<1x1x1x8x256xbf16>
    %86 = vector.shape_cast %85 : vector<1x1x1x8x256xbf16> to vector<8x256xbf16>
    %c0_130 = arith.constant 0 : index
    %c14_131 = arith.constant 14 : index
    %c0_132 = arith.constant 0 : index
    %c0_133 = arith.constant 0 : index
    %87 = vector.load %arg4[%c0_130, %c14_131, %c0_132, %c0_133] : memref<1x15x128x8xbf16, #tpu.memory_space<vmem>>, vector<1x1x128x8xbf16>
    %88 = vector.shape_cast %87 : vector<1x1x128x8xbf16> to vector<128x8xbf16>
    %cst_134 = arith.constant dense<0.000000e+00> : vector<128x256xf32>
    %89 = tpu.matmul %88, %86, %cst_134 {dimension_numbers = #tpu.dot_dimension_numbers<[1], [0], [0], [1], [0, 0, 1, 1], [], []>} : vector<128x8xbf16>, vector<8x256xbf16>, vector<128x256xf32> -> vector<128x256xf32>
    %90 = arith.addf %84, %89 : vector<128x256xf32>
    %c0_135 = arith.constant 0 : index
    %c0_136 = arith.constant 0 : index
    %c0_137 = arith.constant 0 : index
    %91 = vector.load %arg5[%c0_135, %c0_136, %c0_137] : memref<1x128x1xf32, #tpu.memory_space<vmem>>, vector<1x128x1xf32>
    %92 = vector.shape_cast %91 : vector<1x128x1xf32> to vector<128x1xf32>
    %93 = vector.broadcast %92 : vector<128x1xf32> to vector<128x256xf32>
    %94 = arith.addf %90, %93 : vector<128x256xf32>
    %cst_138 = arith.constant 0.000000e+00 : f32
    %95 = vector.broadcast %cst_138 : f32 to vector<128x256xf32>
    %96 = arith.cmpf oge, %94, %95 : vector<128x256xf32>
    %cst_139 = arith.constant 1.000000e-01 : f32
    %97 = vector.broadcast %cst_139 : f32 to vector<128x256xf32>
    %98 = arith.mulf %97, %94 : vector<128x256xf32>
    %99 = arith.select %96, %94, %98 : vector<128x256xi1>, vector<128x256xf32>
    %c0_140 = arith.constant 0 : index
    %c0_141 = arith.constant 0 : index
    %c0_142 = arith.constant 0 : index
    %c0_143 = arith.constant 0 : index
    %100 = vector.load %arg6[%c0_140, %c0_141, %c0_142, %c0_143] : memref<1x1x128x256xf32, #tpu.memory_space<vmem>>, vector<1x1x128x256xf32>
    %101 = vector.shape_cast %100 : vector<1x1x128x256xf32> to vector<128x256xf32>
    %102 = vector.shape_cast %99 : vector<128x256xf32> to vector<1x1x128x256xf32>
    tpu.vector_store %arg6[%c0_140, %c0_141, %c0_142, %c0_143], %102 {strides = array<i32>} : memref<1x1x128x256xf32, #tpu.memory_space<vmem>>, vector<1x1x128x256xf32>,
    return
  }
  func.func @transform_0(%arg0: i32, %arg1: i32, %arg2: i32) -> (i32, i32, i32, i32, i32) {
    %c0_i32 = arith.constant 0 : i32
    %c0_i32_0 = arith.constant 0 : i32
    %c0_i32_1 = arith.constant 0 : i32
    return %arg1, %arg2, %c0_i32, %arg0, %c0_i32_0 : i32, i32, i32, i32, i32
  }
  func.func @transform_1(%arg0: i32, %arg1: i32, %arg2: i32) -> (i32, i32, i32, i32) {
    %c0_i32 = arith.constant 0 : i32
    %c0_i32_0 = arith.constant 0 : i32
    %c0_i32_1 = arith.constant 0 : i32
    %c0_i32_2 = arith.constant 0 : i32
    return %arg0, %c0_i32, %c0_i32_0, %c0_i32_1 : i32, i32, i32, i32
  }
  func.func @transform_2(%arg0: i32, %arg1: i32, %arg2: i32) -> (i32, i32, i32) {
    %c0_i32 = arith.constant 0 : i32
    %c0_i32_0 = arith.constant 0 : i32
    %c0_i32_1 = arith.constant 0 : i32
    return %arg0, %c0_i32, %c0_i32_0 : i32, i32, i32
  }
  func.func @transform_3(%arg0: i32, %arg1: i32, %arg2: i32) -> (i32, i32, i32, i32) {
    %c0_i32 = arith.constant 0 : i32
    %c0_i32_0 = arith.constant 0 : i32
    return %arg1, %arg0, %c0_i32, %arg2 : i32, i32, i32, i32
  }
}

</mosaic_0001>

<bundles_post_ra>
// kernel: tpu_custom_call.1
= control target key start
LH: loop header
LB: loop body
LE: loop exit
PB: predicated region body
PF: predicated region fallthrough
CT: control target
= control target key end

     0   :  { %8 = vsyncpa [#allocation3], 0  ;;  %s6457_s0 = inlined_call_operand.vmem [shape: bf16[2,1,1,8,270], index: 0, kind: input, shape index: {}]   ;;  %s6458_s1 = inlined_call_operand.vmem [shape: bf16[1,15,128,8], index: 1, kind: input, shape index: {}]   ;;  %s6459_s2 = inlined_call_operand.vmem [shape: f32[1,128,1], index: 2, kind: input, shape index: {}]   ;;  %s6460_s3 = inlined_call_operand.hbm [shape: f32[2,1,128,256], index: 3, kind: output, shape index: {}]  }
   0x1   :  { %10 = vsyncpa [#allocation3 + $0x1], 0  ;;  %s5475_s12 = smov 0   ;;  %s5477_s13 = smov 0  }
   0x2   :  { %s5479_s14 = smov 0   ;;  %s5481_s15 = smov 0  }
   0x3   :  { %s5483_s16 = smov 0   ;;  %s5485_s17 = smov 0  }
   0x4 LB: > { %s4212_s18 = sadd.s32 4294967295, %s5435_s17   ;;  %s4213_s19 = sadd.s32 4294967294, %s5435_s17   ;;  %s5435_s17 = sphi %s5485_s17, %s16_s17   ;;  %s5431_s16 = sphi %s5483_s16, %s6467_s16   ;;  %s5427_s15 = sphi %s5481_s15, %s6466_s15   ;;  %s5423_s14 = sphi %s5479_s14, %s6465_s14   ;;  %s5419_s13 = sphi %s5477_s13, %s6464_s13   ;;  %s5415_s12 = sphi %s5475_s12, %s6463_s12  }
   0x5   : > { %s31_s20 = sadd.s32 1, %s5431_s16  ;;  %s128_s21 = sadd.s32 1, %s5423_s14 }
   0x6   : > { %p33_p0 = scmp.ge.s32.totalorder %s31_s20, 2  ;;  %p138_p1 = scmp.ne.s32.totalorder %s5423_s14, %s5419_s13 }
   0x7   : > { %p139_p2 = scmp.eq.s32.totalorder %s4212_s18, 1  ;;  %p144_p3 = scmp.ne.s32.totalorder %s5419_s13, %s5415_s12 }
   0x8   : > { %s6469_s20 = smov (%p33_p0, %s31_s20), 0  ;;  %p145_p5 = scmp.eq.s32.totalorder %s4213_s19, 1 }
   0x9   : > { %p5515_p4 = por %p139_p2, %p138_p1  ;;  %s121_s23 = ssub.s32 %s5431_s16, %s6469_s20 }
   0xa   : > { %p4218_p6 = scmp.ge.s32.totalorder %s5435_s17, 1  ;;  %p126_p7 = scmp.eq.s32.totalorder %s121_s23, 0 }
   0xb   : > { %p5522_p8 = por %p145_p5, %p144_p3  ;;  %p195_p9 = scmp.lt.s32.totalorder %s5435_s17, 3 }
   0xc   : > { %s5528_s25 = scalar_select %p126_p7, %s5423_s14, %s128_s21  }
   0xd   : > { %p196_p10 = pnand %p4218_p6, %p195_p9 }
   0xe   : > { %p237_p11 = scmp.lt.s32.totalorder (!%p196_p10), %s5427_s15, 1  ;;  %v5437_v0 = vmov (!%p196_p10), 0   ;;  %s5438_s4 = smov (!%p196_p10), 127   ;;  %vm351_vm0 = vcmask (!%p196_p10), 1039360   ;;  %vm379_vm1 = vcmask (!%p196_p10), 1043456   ;;  %v5237_v12 = vld [vmem:[%s6458_s1 + $0x40] sm:$0xff] (!%p196_p10)  }
   0xf   : > { %199 = sbr.rel (%p196_p10) target bundleno = 867 (0x363), region = 32  ;;  %418 = vmatprep.mubr.bf16.mxu1 (!%p196_p10), %v5437_v0  ;;  %2015 = vmatprep.mubr.bf16.mxu0 (!%p196_p10), %v5437_v0  ;;  %s5439_s5 = smov (!%p196_p10), 121   ;;  %vm1950_vm2 = vcmask (!%p196_p10), 990208   ;;  %vm354_vm3 = vcmask (!%p196_p10), 64512   ;;  %vm2191_vm4 = vcmask (!%p196_p10), 982016   ;;  %v5238_v19 = vld [vmem:[%s6458_s1 + $0x1c0] sm:$0xff] (!%p196_p10)  }
  0x10   : > { %5232 = vset.pattern.permute.xlu0 (!%p196_p10), %v5437_v0  ;;  %5233 = vset.pattern.permute.xlu1 (!%p196_p10), %v5437_v0  ;;  %s5440_s6 = smov (!%p196_p10), 120   ;;  %s5441_s7 = smov (!%p196_p10), 119   ;;  %v5239_v23 = vld [vmem:[%s6458_s1 + $0x48] sm:$0xff] (!%p196_p10)   ;;  %vm2432_vm5 = vcmask (!%p196_p10), 973824   ;;  %v5241_v32 = vld [vmem:[%s6458_s1 + $0x50] sm:$0xff] (!%p196_p10)   ;;  %vm745_vm6 = vcmask (!%p196_p10), 1031168  }
  0x11   : > { %s5442_s8 = smov (!%p196_p10), 126   ;;  %s5443_s9 = smov (!%p196_p10), 118   ;;  %v5240_v28 = vld [vmem:[%s6458_s1 + $0x1c8] sm:$0xff] (!%p196_p10)   ;;  %v5242_v34 = vld [vmem:[%s6458_s1 + $0x1d0] sm:$0xff] (!%p196_p10)   ;;  %v5243_v38 = vld [vmem:[%s6458_s1 + $0x58] sm:$0xff] (!%p196_p10)   ;;  %vm2673_vm7 = vcmask (!%p196_p10), 965632  }
  0x12   : > { %s5444_s10 = smov (!%p196_p10), 125   ;;  %s5445_s11 = smov (!%p196_p10), 117   ;;  %v5244_v39 = vld [vmem:[%s6458_s1 + $0x1d8] sm:$0xff] (!%p196_p10)   ;;  %v5245_v41 = vld [vmem:[%s6458_s1 + $0x60] sm:$0xff] (!%p196_p10)   ;;  %v5247_v48 = vld [vmem:[%s6458_s1 + $0x68] sm:$0xff] (!%p196_p10)   ;;  %vm986_vm8 = vcmask (!%p196_p10), 1022976  }
  0x13   : > { %s5446_s18 = smov (!%p196_p10), 124   ;;  %s5447_s19 = smov (!%p196_p10), 116   ;;  %v5246_v43 = vld [vmem:[%s6458_s1 + $0x200] sm:$0xff] (!%p196_p10)   ;;  %v5248_v49 = vld [vmem:[%s6458_s1 + $0x208] sm:$0xff] (!%p196_p10)   ;;  %v5249_v50 = vld [vmem:[%s6458_s1 + $0x70] sm:$0xff] (!%p196_p10)   ;;  %vm2914_vm9 = vcmask (!%p196_p10), 957440  }
  0x14   : > { %v5250_v51 = vld [vmem:[%s6458_s1 + $0x210] sm:$0xff] (!%p196_p10)   ;;  %v5251_v52 = vld [vmem:[%s6458_s1 + $0x78] sm:$0xff] (!%p196_p10)   ;;  %v5253_v56 = vld [vmem:[%s6458_s1] sm:$0xff] (!%p196_p10)   ;;  %vm1227_vm10 = vcmask (!%p196_p10), 1014784   ;;  %vm3155_vm11 = vcmask (!%p196_p10), 949248   ;;  %vm1468_vm12 = vcmask (!%p196_p10), 1006592  }
  0x15   : > { %v5252_v54 = vld [vmem:[%s6458_s1 + $0x218] sm:$0xff] (!%p196_p10)   ;;  %v5254_v61 = vld [vmem:[%s6458_s1 + $0x220] sm:$0xff] (!%p196_p10)   ;;  %v5255_v62 = vld [vmem:[%s6458_s1 + $0x8] sm:$0xff] (!%p196_p10)   ;;  %vm3396_vm13 = vcmask (!%p196_p10), 941056   ;;  %vm1709_vm14 = vcmask (!%p196_p10), 998400   ;;  %vm3637_vm15 = vcmask (!%p196_p10), 932864  }
  0x16   : > { %s238_s26 = scalar_select %p237_p11, %s5427_s15, 1  ;;  %v5256_v63 = vld [vmem:[%s6458_s1 + $0x228] sm:$0xff]  }
  0x17   : > { %s234_s28 = sand.u32 1, %s5419_s13  }
  0x18   : > { %s5159_s27 = smul.u32 12, %s238_s26  ;;  %s4219_s29 = sshll.u32 %s234_s28, 8 }
  0x1a   : > { %s249_s30 = scalar_lea.vmem %s6457_s0, %s5159_s27 }
  0x1b   : > { %v5539_v1 = vld [vmem:[%s249_s30 + $0x8] ss:$0 sps:$4 sm:$0xff]   ;;  %v262_v2 = vld [vmem:[%s249_s30] sm:$0xff]  ;;  %s5450_s30 = smov 122  }
  0x1c   : > { %v5541_v3 = vcombine.low %v262_v2, %v262_v2  ;;  %349 = vrot.lane.b32.xlu1 %v5539_v1, %s5438_s4  ;;  %v5544_v4 = vcombine.high %v262_v2, %v262_v2  ;;  %v5257_v2 = vld [vmem:[%s6458_s1 + $0x10] sm:$0xff]  }
  0x1e   : > { %345 = vrot.lane.b32.xlu0 %v5541_v3, %s5438_s4  ;;  %v564_v17 = vsel %vm379_vm1, %v5541_v3, 0 }
  0x20   : > { %1944 = vrot.lane.b32.xlu1 %v5541_v3, %s5439_s5 }
  0x22   : > { %347 = vrot.lane.b32.xlu0 %v5544_v4, %s5438_s4  ;;  %s4708_s4 = sshll.u32 %s5427_s15, 12  ;;  %s6411_s15 = scalar_lea.sflag [#allocation3], %s234_s28 }
  0x24   : > { %1948 = vrot.lane.b32.xlu1 %v5539_v1, %s5439_s5 }
  0x26   : > { %1946 = vrot.lane.b32.xlu0 %v5544_v4, %s5439_s5  ;;  %s5448_s5 = smov 123  }
  0x28   : > { %2187 = vrot.lane.b32.xlu1 %v5544_v4, %s5440_s6 }
  0x2a   : > { %2185 = vrot.lane.b32.xlu0 %v5541_v3, %s5440_s6 }
  0x2c   : > { %2426 = vrot.lane.b32.xlu1 %v5541_v3, %s5441_s7 }
  0x2e   : > { %2189 = vrot.lane.b32.xlu0 %v5539_v1, %s5440_s6 }
  0x30   : > { %2430 = vrot.lane.b32.xlu1 %v5539_v1, %s5441_s7 }
  0x32   : > { %2428 = vrot.lane.b32.xlu0 %v5544_v4, %s5441_s7 }
  0x34   : > { %741 = vrot.lane.b32.xlu1 %v5544_v4, %s5442_s8 }
  0x36   : > { %739 = vrot.lane.b32.xlu0 %v5541_v3, %s5442_s8 }
  0x38   : > { %2667 = vrot.lane.b32.xlu1 %v5541_v3, %s5443_s9 }
  0x3a   : > { %743 = vrot.lane.b32.xlu0 %v5539_v1, %s5442_s8  ;;  %s6402_s8 = scalar_lea.hbm %s6460_s3, %s4708_s4 }
  0x3c   : > { %2671 = vrot.lane.b32.xlu1 %v5539_v1, %s5443_s9 }
  0x3e   : > { %2669 = vrot.lane.b32.xlu0 %v5544_v4, %s5443_s9 }
  0x40   : > { %982 = vrot.lane.b32.xlu1 %v5544_v4, %s5444_s10 }
  0x42   : > { %980 = vrot.lane.b32.xlu0 %v5541_v3, %s5444_s10 }
  0x44   : > { %2908 = vrot.lane.b32.xlu1 %v5541_v3, %s5445_s11 }
  0x46   : > { %984 = vrot.lane.b32.xlu0 %v5539_v1, %s5444_s10  ;;  %s5452_s10 = smov [#allocation2]  }
  0x48   : > { %2912 = vrot.lane.b32.xlu1 %v5539_v1, %s5445_s11 }
  0x4a   : > { %2910 = vrot.lane.b32.xlu0 %v5544_v4, %s5445_s11  ;;  %s5361_s11 = sshll.u32 %s5452_s10, 4  ;;  %s5362_s11 = int_to_ptr.vmem [resolvable:$false] %s5361_s11 }
  0x4c   : > { %1223 = vrot.lane.b32.xlu1 %v5544_v4, %s5446_s18 }
  0x4e   : > { %1221 = vrot.lane.b32.xlu0 %v5541_v3, %s5446_s18 }
  0x50   : > { %3149 = vrot.lane.b32.xlu1 %v5541_v3, %s5447_s19 }
  0x52   : > { %1225 = vrot.lane.b32.xlu0 %v5539_v1, %s5446_s18  ;;  %s5363_s18 = scalar_lea.vmem %s5362_s11, 8192 }
  0x54   : > { %3153 = vrot.lane.b32.xlu1 %v5539_v1, %s5447_s19 }
  0x56   : > { %3151 = vrot.lane.b32.xlu0 %v5544_v4, %s5447_s19 }
  0x58   : > { %1464 = vrot.lane.b32.xlu1 %v5544_v4, %s5448_s5 }
  0x5a   : > { %1462 = vrot.lane.b32.xlu0 %v5541_v3, %s5448_s5 }
  0x5e   : > { %1466 = vrot.lane.b32.xlu0 %v5539_v1, %s5448_s5  ;;  %s5449_s5 = smov 115  }
  0x5f   : > { %3390 = vrot.lane.b32.xlu1 %v5541_v3, %s5449_s5 }
  0x62   : > { %3392 = vrot.lane.b32.xlu0 %v5544_v4, %s5449_s5 }
  0x63   : > { %3394 = vrot.lane.b32.xlu1 %v5539_v1, %s5449_s5  ;;  %s5451_s5 = smov 114  }
  0x66   : > { %1703 = vrot.lane.b32.xlu0 %v5541_v3, %s5450_s30 }
  0x67   : > { %1705 = vrot.lane.b32.xlu1 %v5544_v4, %s5450_s30 }
  0x6a   : > { %1707 = vrot.lane.b32.xlu0 %v5539_v1, %s5450_s30  ;;  %s6358_s30 = scalar_lea.vmem [#allocation2], %s4219_s29 }
  0x6b   : > { %3631 = vrot.lane.b32.xlu1 %v5541_v3, %s5451_s5  ;;  %v5267_v3 = vld [vmem:[%s6458_s1 + $0x38] sm:$0xff]  }
  0x6e   : > { %3633 = vrot.lane.b32.xlu0 %v5544_v4, %s5451_s5 }
  0x6f   : > { %3635 = vrot.lane.b32.xlu1 %v5539_v1, %s5451_s5  ;;  %v5268_v1 = vld [vmem:[%s6458_s1 + $0x258] sm:$0xff]   ;;  %s4089_s5 = sshll.u32 %s6358_s30, 4  ;;  %s6404_s5 = int_to_ptr.vmem [resolvable:$true] %s4089_s5 }
  0x70   : > { %s5357_s9 = scalar_lea.vmem %s6404_s5, 4096  ;;  %p5364_p1 = scmp.lt.s32.totalorder %s6404_s5, %s5362_s11 }
  0x71   : > { %p5358_p12 = scmp.ne.s32.totalorder %s6404_s5, %s5357_s9  ;;  %p5365_p2 = scmp.lt.s32.totalorder %s5363_s18, %s5357_s9 }
  0x73   : > { %p5359_p13 = pnand %p5358_p12, %p5515_p4  ;;  %p5366_p3 = por %p5365_p2, %p5364_p1 }
  0x75   : > { %p5360_p0 = pneg %p5359_p13 }
  0x77   : > { %p5367_p5 = pnand %p5366_p3, %p5360_p0 }
  0x8e   : > { %v350_v5 = vpop.permute.xlu1 %349 }
  0x90   : > { %v346_v6 = vpop.permute.xlu0 %345 }
  0x92   : > { %v1945_v7 = vpop.permute.xlu1 %1944 }
  0x94   : > { %v348_v8 = vpop.permute.xlu0 %347 }
  0x95   : > { %v353_v9 = vsel %vm351_vm0, %v348_v8, %v350_v5  ;;  %v352_v10 = vsel %vm351_vm0, %v346_v6, %v348_v8  ;;  %v5258_v5 = vld [vmem:[%s6458_s1 + $0x230] sm:$0xff]   ;;  %v5259_v6 = vld [vmem:[%s6458_s1 + $0x18] sm:$0xff]  }
  0x96   : > { %4248 = vmatprep.subr.msk.bf16.mxu1 %vm379_vm1, %v353_v9  ;;  %v381_v11 = vsel %vm379_vm1, %v352_v10, 0  ;;  %v1949_v13 = vpop.permute.xlu1 %1948  ;;  %v5261_v9 = vld [vmem:[%s6458_s1 + $0x20] sm:$0xff]  }
  0x97   : > { %387 = vmatpush1.bf16.msra.mxu1 %v381_v11  ;;  %v5262_v11 = vld [vmem:[%s6458_s1 + $0x240] sm:$0xff]  }
  0x98   : > { %v1947_v14 = vpop.permute.xlu0 %1946  ;;  %4265 = vmatprep.subr.msk.bf16.mxu1 %vm379_vm1, %v5544_v4 }
  0x99   : > { %v5582_v15 = vsel %vm1950_vm2, %v1947_v14, %v1949_v13  ;;  %v1951_v16 = vsel %vm1950_vm2, %v1945_v7, %v1947_v14  ;;  %v5260_v7 = vld [vmem:[%s6458_s1 + $0x238] sm:$0xff]  }
  0x9a   : > { %4249 = vmatmul.mubr.msk.bf16.vlgmr.msra.gmra.mrb[0].mxu1 %vm354_vm3, %v5237_v12  ;;  %4463 = vmatprep.subr.msk.bf16.mxu0 %vm379_vm1, %v5582_v15  ;;  %v5590_v18 = vsel %vm379_vm1, %v1951_v16, 0  ;;  %v2188_v20 = vpop.permute.xlu1 %2187 }
  0x9b   : > { %1984 = vmatpush1.bf16.msra.mxu0 %v5590_v18  ;;  %428 = vmatprep.mubr.bf16.mxu1 %v5437_v0 }
  0x9c   : > { %v2186_v21 = vpop.permute.xlu0 %2185  ;;  %570 = vmatpush1.bf16.msra.mxu1 %v564_v17  ;;  %v5263_v17 = vld [vmem:[%s6458_s1 + $0x28] sm:$0xff]  }
  0x9d   : > { %v2192_v22 = vsel %vm2191_vm4, %v2186_v21, %v2188_v20  ;;  %v5266_v21 = vld [vmem:[%s6458_s1 + $0x250] sm:$0xff]  }
  0x9e   : > { %4464 = vmatmul.mubr.msk.bf16.vlgmr.msra.gmra.mrb[0].mxu0 %vm354_vm3, %v5238_v19  ;;  %v2427_v24 = vpop.permute.xlu1 %2426  ;;  %v2219_v25 = vsel %vm379_vm1, %v2192_v22, 0  ;;  %v5264_v19 = vld [vmem:[%s6458_s1 + $0x248] sm:$0xff]  }
  0x9f   : > { %2025 = vmatprep.mubr.bf16.mxu0 %v5437_v0 }
  0xa0   : > { %v2190_v26 = vpop.permute.xlu0 %2189 }
  0xa1   : > { %v2193_v27 = vsel %vm2191_vm4, %v2188_v20, %v2190_v26  ;;  %v5265_v20 = vld [vmem:[%s6458_s1 + $0x30] sm:$0xff]  }
  0xa2   : > { %4250 = vmatmul.mubr.msk.bf16.gmra.mrb[4].mxu1 %vm354_vm3, %v5239_v23  ;;  %4496 = vmatprep.subr.msk.bf16.mxu0 %vm379_vm1, %v2193_v27  ;;  %v2431_v29 = vpop.permute.xlu1 %2430  ;;  %v5269_v23 = vld [vmem:[%s6458_s1 + $0x80] sm:$0xff]  }
  0xa3   : > { %2225 = vmatpush1.bf16.msra.mxu0 %v2219_v25  ;;  %438 = vmatprep.mubr.bf16.mxu1 %v5437_v0 }
  0xa4   : > { %v2429_v30 = vpop.permute.xlu0 %2428 }
  0xa5   : > { %v2434_v31 = vsel %vm2432_vm5, %v2429_v30, %v2431_v29  ;;  %v2433_v42 = vsel %vm2432_vm5, %v2427_v24, %v2429_v30  ;;  %v5271_v29 = vld [vmem:[%s6458_s1 + $0x88] sm:$0xff]  }
  0xa6   : > { %4465 = vmatmul.mubr.msk.bf16.gmra.mrb[4].mxu0 %vm354_vm3, %v5240_v28  ;;  %4529 = vmatprep.subr.msk.bf16.mxu0 %vm379_vm1, %v2434_v31  ;;  %v742_v35 = vpop.permute.xlu1 %741  ;;  %v2460_v46 = vsel %vm379_vm1, %v2433_v42, 0  ;;  %v5270_v28 = vld [vmem:[%s6458_s1 + $0x260] sm:$0xff]   ;;  %v5272_v30 = vld [vmem:[%s6458_s1 + $0x268] sm:$0xff]   ;;  %v5273_v31 = vld [vmem:[%s6458_s1 + $0x90] sm:$0xff]  }
  0xa7   : > { %2035 = vmatprep.mubr.bf16.mxu0 %v5437_v0 }
  0xa8   : > { %v740_v33 = vpop.permute.xlu0 %739 }
  0xa9   : > { %v746_v55 = vsel %vm745_vm6, %v740_v33, %v742_v35  ;;  %v5275_v33 = vld [vmem:[%s6458_s1 + $0x98] sm:$0xff]  }
  0xaa   : > { %4251 = vmatmul.mubr.msk.bf16.gmra.mrb[8].mxu1 %vm354_vm3, %v5241_v32  ;;  %v5636_v40 = vpop.permute.xlu1 %2667  ;;  %v773_v59 = vsel %vm379_vm1, %v746_v55, 0  ;;  %v5274_v32 = vld [vmem:[%s6458_s1 + $0x270] sm:$0xff]  }
  0xab   : > { %448 = vmatprep.mubr.bf16.mxu1 %v5437_v0 }
  0xac   : > { %v744_v36 = vpop.permute.xlu0 %743 }
  0xad   : > { %v747_v37 = vsel %vm745_vm6, %v742_v35, %v744_v36  ;;  %v5277_v36 = vld [vmem:[%s6458_s1 + $0xa0] sm:$0xff]  }
  0xae   : > { %4466 = vmatmul.mubr.msk.bf16.gmra.mrb[8].mxu0 %vm354_vm3, %v5242_v34  ;;  %4298 = vmatprep.subr.msk.bf16.mxu1 %vm379_vm1, %v747_v37  ;;  %v2672_v44 = vpop.permute.xlu1 %2671  ;;  %v5276_v34 = vld [vmem:[%s6458_s1 + $0x278] sm:$0xff]  }
  0xaf   : > { %2045 = vmatprep.mubr.bf16.mxu0 %v5437_v0 }
  0xb0   : > { %v5648_v45 = vpop.permute.xlu0 %2669 }
  0xb1   : > { %v2675_v47 = vsel %vm2673_vm7, %v5648_v45, %v2672_v44  ;;  %v2674_v10 = vsel %vm2673_vm7, %v5636_v40, %v5648_v45  ;;  %v5280_v44 = vld [vmem:[%s6458_s1 + $0x288] sm:$0xff]   ;;  %v5281_v45 = vld [vmem:[%s6458_s1 + $0xb0] sm:$0xff]  }
  0xb2   : > { %4252 = vmatmul.mubr.msk.bf16.gmra.mrb[12].mxu1 %vm354_vm3, %v5243_v38  ;;  %v5695_v57 = vpop.permute.xlu1 %982  ;;  %v2701_v14 = vsel %vm379_vm1, %v2674_v10, 0  ;;  %v5278_v38 = vld [vmem:[%s6458_s1 + $0x280] sm:$0xff]  }
  0xb3   : > { %458 = vmatprep.mubr.bf16.mxu1 %v5437_v0 }
  0xb4   : > { %v5683_v53 = vpop.permute.xlu0 %980 }
  0xb5   : > { %v987_v22 = vsel %vm986_vm8, %v5683_v53, %v5695_v57 }
  0xb6   : > { %4467 = vmatmul.mubr.msk.bf16.gmra.mrb[12].mxu0 %vm354_vm3, %v5244_v39  ;;  %v5740_v8 = vpop.permute.xlu1 %2908  ;;  %v1014_v26 = vsel %vm379_vm1, %v987_v22, 0 }
  0xb7   : > { %2256 = vmatprep.mubr.bf16.mxu0 %v5437_v0 }
  0xb8   : > { %v985_v58 = vpop.permute.xlu0 %984 }
  0xb9   : > { %v988_v60 = vsel %vm986_vm8, %v5695_v57, %v985_v58  ;;  %v5287_v57 = vld [vmem:[%s6458_s1 + $0xc8] sm:$0xff]  }
  0xba   : > { %4253 = vmatmul.mubr.msk.bf16.gmra.mrb[16].mxu1 %vm354_vm3, %v5245_v41  ;;  %v2913_v12 = vpop.permute.xlu1 %2912  ;;  %v5288_v58 = vld [vmem:[%s6458_s1 + $0x2a8] sm:$0xff]  }
  0xbb   : > { %468 = vmatprep.mubr.bf16.mxu1 %v5437_v0 }
  0xbc   : > { %v5754_v13 = vpop.permute.xlu0 %2910 }
  0xbd   : > { %v2916_v16 = vsel %vm2914_vm9, %v5754_v13, %v2913_v12  ;;  %v2915_v37 = vsel %vm2914_vm9, %v5740_v8, %v5754_v13  ;;  %v5296_v12 = vld [vmem:[%s6458_s1 + $0x2c8] sm:$0xff]   ;;  %v5297_v13 = vld [vmem:[%s6458_s1 + $0xf0] sm:$0xff]  }
  0xbe   : > { %4497 = vmatmul.mubr.msk.bf16.vlgmr.msra.gmra.mrb[0].mxu0 %vm354_vm3, %v5246_v43  ;;  %v5803_v24 = vpop.permute.xlu1 %1223  ;;  %v2942_v41 = vsel %vm379_vm1, %v2915_v37, 0  ;;  %v5279_v43 = vld [vmem:[%s6458_s1 + $0xa8] sm:$0xff]  }
  0xbf   : > { %2466 = vmatpush1.bf16.msra.mxu0 %v2460_v46  ;;  %2266 = vmatprep.mubr.bf16.mxu0 %v5437_v0  ;;  %v5282_v46 = vld [vmem:[%s6458_s1 + $0x290] sm:$0xff]  }
  0xc0   : > { %4562 = vmatprep.subr.msk.bf16.mxu0 %vm379_vm1, %v2675_v47  ;;  %v5789_v4 = vpop.permute.xlu0 %1221  ;;  %v5283_v47 = vld [vmem:[%s6458_s1 + $0xb8] sm:$0xff]  }
  0xc2   : > { %4254 = vmatmul.mubr.msk.bf16.gmra.mrb[20].mxu1 %vm354_vm3, %v5247_v48  ;;  %v5845_v35 = vpop.permute.xlu1 %3149  ;;  %v5284_v48 = vld [vmem:[%s6458_s1 + $0x298] sm:$0xff]  }
  0xc3   : > { %478 = vmatprep.mubr.bf16.mxu1 %v5437_v0 }
  0xc4   : > { %v1226_v25 = vpop.permute.xlu0 %1225 }
  0xc5   : > { %v1229_v27 = vsel %vm1227_vm10, %v5803_v24, %v1226_v25  ;;  %v5304_v25 = vld [vmem:[%s6458_s1 + $0x2e8] sm:$0xff]  }
  0xc6   : > { %4498 = vmatmul.mubr.msk.bf16.gmra.mrb[4].mxu0 %vm354_vm3, %v5248_v49  ;;  %v3154_v39 = vpop.permute.xlu1 %3153 }
  0xc7   : > { %2276 = vmatprep.mubr.bf16.mxu0 %v5437_v0 }
  0xc8   : > { %v3152_v40 = vpop.permute.xlu0 %3151 }
  0xc9   : > { %v3157_v42 = vsel %vm3155_vm11, %v3152_v40, %v3154_v39  ;;  %v5312_v39 = vld [vmem:[%s6458_s1 + $0x308] sm:$0xff]  }
  0xca   : > { %4255 = vmatmul.mubr.msk.bf16.gmra.mrb[24].mxu1 %vm354_vm3, %v5249_v50  ;;  %v1228_v50 = vsel %vm1227_vm10, %v5789_v4, %v5803_v24  ;;  %v1465_v53 = vpop.permute.xlu1 %1464  ;;  %v5303_v24 = vld [vmem:[%s6458_s1 + $0x108] sm:$0xff]  }
  0xcb   : > { %488 = vmatprep.mubr.bf16.mxu1 %v5437_v0 }
  0xcc   : > { %v5892_v49 = vpop.permute.xlu0 %1462 }
  0xce   : > { %4499 = vmatmul.mubr.msk.bf16.gmra.mrb[8].mxu0 %vm354_vm3, %v5250_v51  ;;  %v5285_v51 = vld [vmem:[%s6458_s1 + $0xc0] sm:$0xff]  }
  0xcf   : > { %2286 = vmatprep.mubr.bf16.mxu0 %v5437_v0 }
  0xd2   : > { %4256 = vmatmul.mubr.msk.bf16.gmra.mrb[28].mxu1 %vm354_vm3, %v5251_v52  ;;  %v1255_v52 = vsel %vm379_vm1, %v1228_v50, 0  ;;  %v5322_v50 = vld [vmem:[%s6458_s1 + $0x330] sm:$0xff]  }
  0xd3   : > { %601 = vmatprep.mubr.bf16.mxu1 %v5437_v0 }
  0xd6   : > { %4500 = vmatmul.mubr.msk.bf16.gmra.mrb[12].mxu0 %vm354_vm3, %v5252_v54  ;;  %v1467_v54 = vpop.permute.xlu0 %1466 }
  0xd7   : > { %2296 = vmatprep.mubr.bf16.mxu0 %v5437_v0  ;;  %v1470_v55 = vsel %vm1468_vm12, %v1465_v53, %v1467_v54  ;;  %v3815_v54 = vld [vmem:[%s6459_s2] sm:$0xff] }
  0xd8   : > { %3833 = vperm.xlu0 %5232, %v3815_v54  }
  0xda   : > { %4266 = vmatmul.mubr.msk.bf16.vlgmr.msra.gmra.mrb[0].mxu1 %vm354_vm3, %v5253_v56  ;;  %v5286_v56 = vld [vmem:[%s6458_s1 + $0x2a0] sm:$0xff]  }
  0xdb   : > { %779 = vmatpush1.bf16.msra.mxu1 %v773_v59  ;;  %611 = vmatprep.mubr.bf16.mxu1 %v5437_v0  ;;  %v5289_v59 = vld [vmem:[%s6458_s1 + $0xd0] sm:$0xff]  }
  0xdc   : > { %4331 = vmatprep.subr.msk.bf16.mxu1 %vm379_vm1, %v988_v60  ;;  %v5290_v60 = vld [vmem:[%s6458_s1 + $0x2b0] sm:$0xff]  }
  0xde   : > { %4501 = vmatmul.mubr.msk.bf16.gmra.mrb[16].mxu0 %vm354_vm3, %v5254_v61  ;;  %v5291_v61 = vld [vmem:[%s6458_s1 + $0xd8] sm:$0xff]  }
  0xdf   : > { %2306 = vmatprep.mubr.bf16.mxu0 %v5437_v0 }
  0xe2   : > { %4267 = vmatmul.mubr.msk.bf16.gmra.mrb[4].mxu1 %vm354_vm3, %v5255_v62  ;;  %v5292_v62 = vld [vmem:[%s6458_s1 + $0x2b8] sm:$0xff]  }
  0xe3   : > { %621 = vmatprep.mubr.bf16.mxu1 %v5437_v0 }
  0xe6   : > { %4502 = vmatmul.mubr.msk.bf16.gmra.mrb[20].mxu0 %vm354_vm3, %v5256_v63  ;;  %v5293_v63 = vld [vmem:[%s6458_s1 + $0xe0] sm:$0xff]  }
  0xe7   : > { %2316 = vmatprep.mubr.bf16.mxu0 %v5437_v0 }
  0xea   : > { %4268 = vmatmul.mubr.msk.bf16.gmra.mrb[8].mxu1 %vm354_vm3, %v5257_v2  ;;  %v5945_v2 = vpop.permute.xlu1 %3390 }
  0xeb   : > { %631 = vmatprep.mubr.bf16.mxu1 %v5437_v0 }
  0xee   : > { %4503 = vmatmul.mubr.msk.bf16.gmra.mrb[24].mxu0 %vm354_vm3, %v5258_v5  ;;  %v3156_v5 = vsel %vm3155_vm11, %v5845_v35, %v3152_v40  ;;  %v3395_v8 = vpop.permute.xlu1 %3394  ;;  %v5313_v40 = vld [vmem:[%s6458_s1 + $0x130] sm:$0xff]  }
  0xef   : > { %2326 = vmatprep.mubr.bf16.mxu0 %v5437_v0 }
  0xf2   : > { %4269 = vmatmul.mubr.msk.bf16.gmra.mrb[12].mxu1 %vm354_vm3, %v5259_v6  ;;  %v5294_v6 = vld [vmem:[%s6458_s1 + $0x2c0] sm:$0xff]  }
  0xf3   : > { %641 = vmatprep.mubr.bf16.mxu1 %v5437_v0 }
  0xf6   : > { %4504 = vmatmul.mubr.msk.bf16.gmra.mrb[28].mxu0 %vm354_vm3, %v5260_v7  ;;  %v3183_v7 = vsel %vm379_vm1, %v3156_v5, 0  ;;  %v3822_v5 = vld [vmem:[%s6459_s2 + $0x38] sm:$0xff] }
  0xf7   : > { %2497 = vmatprep.mubr.bf16.mxu0 %v5437_v0 }
  0xfa   : > { %4270 = vmatmul.mubr.msk.bf16.gmra.mrb[16].mxu1 %vm354_vm3, %v5261_v9  ;;  %v3393_v9 = vpop.permute.xlu0 %3392 }
  0xfb   : > { %651 = vmatprep.mubr.bf16.mxu1 %v5437_v0  ;;  %v3398_v10 = vsel %vm3396_vm13, %v3393_v9, %v3395_v8  ;;  %v3824_v8 = vld [vmem:[%s6459_s2 + $0x48] sm:$0xff] }
  0xfe   : > { %4530 = vmatmul.mubr.msk.bf16.vlgmr.msra.gmra.mrb[0].mxu0 %vm354_vm3, %v5262_v11  ;;  %v5295_v11 = vld [vmem:[%s6458_s1 + $0xe8] sm:$0xff]  }
  0xff   : > { %2707 = vmatpush1.bf16.msra.mxu0 %v2701_v14  ;;  %2507 = vmatprep.mubr.bf16.mxu0 %v5437_v0  ;;  %v5298_v14 = vld [vmem:[%s6458_s1 + $0x2d0] sm:$0xff]  }
 0x100   : > { %4595 = vmatprep.subr.msk.bf16.mxu0 %vm379_vm1, %v2916_v16  ;;  %v5299_v16 = vld [vmem:[%s6458_s1 + $0xf8] sm:$0xff]  }
 0x102   : > { %4271 = vmatmul.mubr.msk.bf16.gmra.mrb[20].mxu1 %vm354_vm3, %v5263_v17  ;;  %v5983_v17 = vpop.permute.xlu0 %1703 }
 0x103   : > { %661 = vmatprep.mubr.bf16.mxu1 %v5437_v0 }
 0x106   : > { %4531 = vmatmul.mubr.msk.bf16.gmra.mrb[4].mxu0 %vm354_vm3, %v5264_v19  ;;  %v5300_v19 = vld [vmem:[%s6458_s1 + $0x2d8] sm:$0xff]   ;;  %v1708_v4 = vpop.permute.xlu0 %1707 }
 0x107   : > { %2517 = vmatprep.mubr.bf16.mxu0 %v5437_v0 }
 0x10a   : > { %4272 = vmatmul.mubr.msk.bf16.gmra.mrb[24].mxu1 %vm354_vm3, %v5265_v20  ;;  %v1469_v20 = vsel %vm1468_vm12, %v5892_v49, %v1465_v53  ;;  %v3634_v35 = vpop.permute.xlu0 %3633  ;;  %v5320_v49 = vld [vmem:[%s6458_s1 + $0x328] sm:$0xff]   ;;  %v5325_v53 = vld [vmem:[%s6458_s1 + $0x160] sm:$0xff]  }
 0x10b   : > { %671 = vmatprep.mubr.bf16.mxu1 %v5437_v0 }
 0x10e   : > { %4532 = vmatmul.mubr.msk.bf16.gmra.mrb[8].mxu0 %vm354_vm3, %v5266_v21  ;;  %v5301_v21 = vld [vmem:[%s6458_s1 + $0x100] sm:$0xff]  }
 0x10f   : > { %2527 = vmatprep.mubr.bf16.mxu0 %v5437_v0 }
 0x112   : > { %4273 = vmatmul.mubr.msk.bf16.gmra.mrb[28].mxu1 %vm354_vm3, %v5267_v3  ;;  %v1706_v3 = vpop.permute.xlu1 %1705 }
 0x113   : > { %810 = vmatprep.mubr.bf16.mxu1 %v5437_v0  ;;  %v1711_v22 = vsel %vm1709_vm14, %v1706_v3, %v1708_v4  ;;  %v5335_v4 = vld [vmem:[%s6458_s1 + $0x188] sm:$0xff]  }
 0x116   : > { %4533 = vmatmul.mubr.msk.bf16.gmra.mrb[12].mxu0 %vm354_vm3, %v5268_v1  ;;  %v1496_v1 = vsel %vm379_vm1, %v1469_v20, 0  ;;  %v5332_v20 = vld [vmem:[%s6458_s1 + $0x358] sm:$0xff]  }
 0x117   : > { %2537 = vmatprep.mubr.bf16.mxu0 %v5437_v0 }
 0x11a   : > { %4299 = vmatmul.mubr.msk.bf16.vlgmr.msra.gmra.mrb[0].mxu1 %vm354_vm3, %v5269_v23  ;;  %v5302_v23 = vld [vmem:[%s6458_s1 + $0x2e0] sm:$0xff]  }
 0x11b   : > { %1020 = vmatpush1.bf16.msra.mxu1 %v1014_v26  ;;  %820 = vmatprep.mubr.bf16.mxu1 %v5437_v0  ;;  %v5305_v26 = vld [vmem:[%s6458_s1 + $0x110] sm:$0xff]  }
 0x11c   : > { %4364 = vmatprep.subr.msk.bf16.mxu1 %vm379_vm1, %v1229_v27  ;;  %v5306_v27 = vld [vmem:[%s6458_s1 + $0x2f0] sm:$0xff]  }
 0x11e   : > { %4534 = vmatmul.mubr.msk.bf16.gmra.mrb[16].mxu0 %vm354_vm3, %v5270_v28  ;;  %v5307_v28 = vld [vmem:[%s6458_s1 + $0x118] sm:$0xff]  }
 0x11f   : > { %2547 = vmatprep.mubr.bf16.mxu0 %v5437_v0 }
 0x122   : > { %4300 = vmatmul.mubr.msk.bf16.gmra.mrb[4].mxu1 %vm354_vm3, %v5271_v29  ;;  %v5308_v29 = vld [vmem:[%s6458_s1 + $0x2f8] sm:$0xff]  }
 0x123   : > { %830 = vmatprep.mubr.bf16.mxu1 %v5437_v0 }
 0x126   : > { %4535 = vmatmul.mubr.msk.bf16.gmra.mrb[20].mxu0 %vm354_vm3, %v5272_v30  ;;  %v6035_v30 = vpop.permute.xlu1 %3631 }
 0x127   : > { %2557 = vmatprep.mubr.bf16.mxu0 %v5437_v0 }
 0x12a   : > { %4301 = vmatmul.mubr.msk.bf16.gmra.mrb[8].mxu1 %vm354_vm3, %v5273_v31  ;;  %v5309_v31 = vld [vmem:[%s6458_s1 + $0x120] sm:$0xff]  }
 0x12b   : > { %840 = vmatprep.mubr.bf16.mxu1 %v5437_v0 }
 0x12e   : > { %4536 = vmatmul.mubr.msk.bf16.gmra.mrb[24].mxu0 %vm354_vm3, %v5274_v32  ;;  %v3397_v32 = vsel %vm3396_vm13, %v5945_v2, %v3393_v9  ;;  %v3821_v2 = vld [vmem:[%s6459_s2 + $0x30] sm:$0xff] }
 0x12f   : > { %2567 = vmatprep.mubr.bf16.mxu0 %v5437_v0  ;;  %v5329_v9 = vld [vmem:[%s6458_s1 + $0x170] sm:$0xff]  }
 0x132   : > { %4302 = vmatmul.mubr.msk.bf16.gmra.mrb[12].mxu1 %vm354_vm3, %v5275_v33  ;;  %v5310_v33 = vld [vmem:[%s6458_s1 + $0x300] sm:$0xff]  }
 0x133   : > { %850 = vmatprep.mubr.bf16.mxu1 %v5437_v0 }
 0x136   : > { %4537 = vmatmul.mubr.msk.bf16.gmra.mrb[28].mxu0 %vm354_vm3, %v5276_v34  ;;  %v3636_v34 = vpop.permute.xlu1 %3635 }
 0x137   : > { %2738 = vmatprep.mubr.bf16.mxu0 %v5437_v0  ;;  %v3639_v37 = vsel %vm3637_vm15, %v3634_v35, %v3636_v34  ;;  %v5350_v34 = vld [vmem:[%s6458_s1 + $0x3a0] sm:$0xff]  }
 0x13a   : > { %4303 = vmatmul.mubr.msk.bf16.gmra.mrb[16].mxu1 %vm354_vm3, %v5277_v36  ;;  %v3424_v36 = vsel %vm379_vm1, %v3397_v32, 0  ;;  %v5348_v32 = vld [vmem:[%s6458_s1 + $0x398] sm:$0xff]  }
 0x13b   : > { %860 = vmatprep.mubr.bf16.mxu1 %v5437_v0 }
 0x13e   : > { %4563 = vmatmul.mubr.msk.bf16.vlgmr.msra.gmra.mrb[0].mxu0 %vm354_vm3, %v5278_v38  ;;  %v5311_v38 = vld [vmem:[%s6458_s1 + $0x128] sm:$0xff]  }
 0x13f   : > { %2948 = vmatpush1.bf16.msra.mxu0 %v2942_v41  ;;  %2748 = vmatprep.mubr.bf16.mxu0 %v5437_v0  ;;  %v5314_v41 = vld [vmem:[%s6458_s1 + $0x310] sm:$0xff]  }
 0x140   : > { %4628 = vmatprep.subr.msk.bf16.mxu0 %vm379_vm1, %v3157_v42  ;;  %v5315_v42 = vld [vmem:[%s6458_s1 + $0x138] sm:$0xff]  }
 0x142   : > { %4304 = vmatmul.mubr.msk.bf16.gmra.mrb[20].mxu1 %vm354_vm3, %v5279_v43  ;;  %v5316_v43 = vld [vmem:[%s6458_s1 + $0x318] sm:$0xff]  }
 0x143   : > { %870 = vmatprep.mubr.bf16.mxu1 %v5437_v0 }
 0x146   : > { %4564 = vmatmul.mubr.msk.bf16.gmra.mrb[4].mxu0 %vm354_vm3, %v5280_v44  ;;  %v1710_v44 = vsel %vm1709_vm14, %v5983_v17, %v1706_v3  ;;  %v3829_v17 = vld [vmem:[%s6459_s2 + $0x70] sm:$0xff]  ;;  %v5334_v3 = vld [vmem:[%s6458_s1 + $0x360] sm:$0xff]  }
 0x147   : > { %2758 = vmatprep.mubr.bf16.mxu0 %v5437_v0 }
 0x14a   : > { %4305 = vmatmul.mubr.msk.bf16.gmra.mrb[24].mxu1 %vm354_vm3, %v5281_v45  ;;  %v5317_v45 = vld [vmem:[%s6458_s1 + $0x140] sm:$0xff]  }
 0x14b   : > { %880 = vmatprep.mubr.bf16.mxu1 %v5437_v0 }
 0x14e   : > { %4565 = vmatmul.mubr.msk.bf16.gmra.mrb[8].mxu0 %vm354_vm3, %v5282_v46  ;;  %v1737_v46 = vsel %vm379_vm1, %v1710_v44, 0 }
 0x14f   : > { %2768 = vmatprep.mubr.bf16.mxu0 %v5437_v0 }
 0x152   : > { %4306 = vmatmul.mubr.msk.bf16.gmra.mrb[28].mxu1 %vm354_vm3, %v5283_v47  ;;  %v5318_v47 = vld [vmem:[%s6458_s1 + $0x320] sm:$0xff]  }
 0x153   : > { %1051 = vmatprep.mubr.bf16.mxu1 %v5437_v0 }
 0x156   : > { %4566 = vmatmul.mubr.msk.bf16.gmra.mrb[12].mxu0 %vm354_vm3, %v5284_v48  ;;  %v5319_v48 = vld [vmem:[%s6458_s1 + $0x148] sm:$0xff]  }
 0x157   : > { %2778 = vmatprep.mubr.bf16.mxu0 %v5437_v0 }
 0x15a   : > { %4332 = vmatmul.mubr.msk.bf16.vlgmr.msra.gmra.mrb[0].mxu1 %vm354_vm3, %v5285_v51  ;;  %v5323_v51 = vld [vmem:[%s6458_s1 + $0x158] sm:$0xff]  }
 0x15b   : > { %1261 = vmatpush1.bf16.msra.mxu1 %v1255_v52  ;;  %1061 = vmatprep.mubr.bf16.mxu1 %v5437_v0  ;;  %v5324_v52 = vld [vmem:[%s6458_s1 + $0x338] sm:$0xff]  }
 0x15c   : > { %4397 = vmatprep.subr.msk.bf16.mxu1 %vm379_vm1, %v1470_v55  ;;  %v3816_v55 = vld [vmem:[%s6459_s2 + $0x8] sm:$0xff] }
 0x15d   : > { %3838 = vperm.xlu1 %5233, %v3816_v55  }
 0x15e   : > { %4567 = vmatmul.mubr.msk.bf16.gmra.mrb[16].mxu0 %vm354_vm3, %v5286_v56  ;;  %v3818_v56 = vld [vmem:[%s6459_s2 + $0x18] sm:$0xff] }
 0x15f   : > { %2788 = vmatprep.mubr.bf16.mxu0 %v5437_v0  ;;  %3848 = vperm.xlu0 %5232, %v3818_v56   ;;  %v3834_v56 = vpop.permute.xlu0 %3833 }
 0x162   : > { %4333 = vmatmul.mubr.msk.bf16.gmra.mrb[4].mxu1 %vm354_vm3, %v5287_v57  ;;  %v3638_v57 = vsel %vm3637_vm15, %v6035_v30, %v3634_v35  ;;  %v5346_v30 = vld [vmem:[%s6458_s1 + $0x390] sm:$0xff]   ;;  %v5351_v35 = vld [vmem:[%s6458_s1 + $0x1e8] sm:$0xff]  }
 0x163   : > { %1071 = vmatprep.mubr.bf16.mxu1 %v5437_v0 }
 0x166   : > { %4568 = vmatmul.mubr.msk.bf16.gmra.mrb[20].mxu0 %vm354_vm3, %v5288_v58  ;;  %v3817_v58 = vld [vmem:[%s6459_s2 + $0x10] sm:$0xff] }
 0x167   : > { %2798 = vmatprep.mubr.bf16.mxu0 %v5437_v0  ;;  %3843 = vperm.xlu1 %5233, %v3817_v58  }
 0x16a   : > { %4334 = vmatmul.mubr.msk.bf16.gmra.mrb[8].mxu1 %vm354_vm3, %v5289_v59  ;;  %v5326_v59 = vld [vmem:[%s6458_s1 + $0x340] sm:$0xff]  }
 0x16b   : > { %1081 = vmatprep.mubr.bf16.mxu1 %v5437_v0 }
 0x16e   : > { %4569 = vmatmul.mubr.msk.bf16.gmra.mrb[24].mxu0 %vm354_vm3, %v5290_v60  ;;  %v3665_v60 = vsel %vm379_vm1, %v3638_v57, 0 }
 0x16f   : > { %2808 = vmatprep.mubr.bf16.mxu0 %v5437_v0 }
 0x172   : > { %4335 = vmatmul.mubr.msk.bf16.gmra.mrb[12].mxu1 %vm354_vm3, %v5291_v61  ;;  %v3819_v61 = vld [vmem:[%s6459_s2 + $0x20] sm:$0xff] }
 0x173   : > { %1091 = vmatprep.mubr.bf16.mxu1 %v5437_v0  ;;  %3853 = vperm.xlu1 %5233, %v3819_v61  }
 0x176   : > { %4570 = vmatmul.mubr.msk.bf16.gmra.mrb[28].mxu0 %vm354_vm3, %v5292_v62  ;;  %v3820_v62 = vld [vmem:[%s6459_s2 + $0x28] sm:$0xff] }
 0x177   : > { %2979 = vmatprep.mubr.bf16.mxu0 %v5437_v0  ;;  %3858 = vperm.xlu0 %5232, %v3820_v62  }
 0x178   : > { %3863 = vperm.xlu1 %5233, %v3821_v2  }
 0x17a   : > { %4336 = vmatmul.mubr.msk.bf16.gmra.mrb[16].mxu1 %vm354_vm3, %v5293_v63  ;;  %v5327_v63 = vld [vmem:[%s6458_s1 + $0x168] sm:$0xff]  }
 0x17b   : > { %1101 = vmatprep.mubr.bf16.mxu1 %v5437_v0  ;;  %3868 = vperm.xlu0 %5232, %v3822_v5  }
 0x17e   : > { %4596 = vmatmul.mubr.msk.bf16.vlgmr.msra.gmra.mrb[0].mxu0 %vm354_vm3, %v5294_v6  ;;  %v5328_v6 = vld [vmem:[%s6458_s1 + $0x348] sm:$0xff]  }
 0x17f   : > { %3189 = vmatpush1.bf16.msra.mxu0 %v3183_v7  ;;  %2989 = vmatprep.mubr.bf16.mxu0 %v5437_v0  ;;  %v3823_v7 = vld [vmem:[%s6459_s2 + $0x40] sm:$0xff] }
 0x180   : > { %4661 = vmatprep.subr.msk.bf16.mxu0 %vm379_vm1, %v3398_v10  ;;  %3873 = vperm.xlu1 %5233, %v3823_v7   ;;  %v3825_v10 = vld [vmem:[%s6459_s2 + $0x50] sm:$0xff] }
 0x181   : > { %3878 = vperm.xlu0 %5232, %v3824_v8  }
 0x182   : > { %4337 = vmatmul.mubr.msk.bf16.gmra.mrb[20].mxu1 %vm354_vm3, %v5295_v11  ;;  %v3826_v11 = vld [vmem:[%s6459_s2 + $0x58] sm:$0xff] }
 0x183   : > { %1111 = vmatprep.mubr.bf16.mxu1 %v5437_v0 }
 0x184   : > { %3883 = vperm.xlu1 %5233, %v3825_v10  }
 0x185   : > { %3888 = vperm.xlu0 %5232, %v3826_v11  }
 0x186   : > { %4597 = vmatmul.mubr.msk.bf16.gmra.mrb[4].mxu0 %vm354_vm3, %v5296_v12  ;;  %v5330_v12 = vld [vmem:[%s6458_s1 + $0x350] sm:$0xff]  }
 0x187   : > { %2999 = vmatprep.mubr.bf16.mxu0 %v5437_v0 }
 0x18a   : > { %4338 = vmatmul.mubr.msk.bf16.gmra.mrb[24].mxu1 %vm354_vm3, %v5297_v13  ;;  %v3827_v13 = vld [vmem:[%s6459_s2 + $0x60] sm:$0xff] }
 0x18b   : > { %1121 = vmatprep.mubr.bf16.mxu1 %v5437_v0  ;;  %3893 = vperm.xlu1 %5233, %v3827_v13  }
 0x18e   : > { %4598 = vmatmul.mubr.msk.bf16.gmra.mrb[8].mxu0 %vm354_vm3, %v5298_v14  ;;  %v3828_v14 = vld [vmem:[%s6459_s2 + $0x68] sm:$0xff] }
 0x18f   : > { %3009 = vmatprep.mubr.bf16.mxu0 %v5437_v0  ;;  %3898 = vperm.xlu0 %5232, %v3828_v14  }
 0x190   : > { %3903 = vperm.xlu1 %5233, %v3829_v17  }
 0x192   : > { %4339 = vmatmul.mubr.msk.bf16.gmra.mrb[28].mxu1 %vm354_vm3, %v5299_v16  ;;  %v5331_v16 = vld [vmem:[%s6458_s1 + $0x178] sm:$0xff]  }
 0x193   : > { %1292 = vmatprep.mubr.bf16.mxu1 %v5437_v0 }
 0x196   : > { %4599 = vmatmul.mubr.msk.bf16.gmra.mrb[12].mxu0 %vm354_vm3, %v5300_v19  ;;  %v3830_v19 = vld [vmem:[%s6459_s2 + $0x78] sm:$0xff] }
 0x197   : > { %3019 = vmatprep.mubr.bf16.mxu0 %v5437_v0  ;;  %3908 = vperm.xlu0 %5232, %v3830_v19  }
 0x19a   : > { %4365 = vmatmul.mubr.msk.bf16.vlgmr.msra.gmra.mrb[0].mxu1 %vm354_vm3, %v5301_v21  ;;  %v5333_v21 = vld [vmem:[%s6458_s1 + $0x180] sm:$0xff]  }
 0x19b   : > { %1502 = vmatpush1.bf16.msra.mxu1 %v1496_v1  ;;  %1302 = vmatprep.mubr.bf16.mxu1 %v5437_v0  ;;  %v5336_v1 = vld [vmem:[%s6458_s1 + $0x368] sm:$0xff]  }
 0x19c   : > { %4430 = vmatprep.subr.msk.bf16.mxu1 %vm379_vm1, %v1711_v22  ;;  %v5338_v22 = vld [vmem:[%s6458_s1 + $0x370] sm:$0xff]  }
 0x19e   : > { %4600 = vmatmul.mubr.msk.bf16.gmra.mrb[16].mxu0 %vm354_vm3, %v5302_v23  ;;  %v5339_v23 = vld [vmem:[%s6458_s1 + $0x198] sm:$0xff]  }
 0x19f   : > { %3029 = vmatprep.mubr.bf16.mxu0 %v5437_v0 }
 0x1a2   : > { %4366 = vmatmul.mubr.msk.bf16.gmra.mrb[4].mxu1 %vm354_vm3, %v5303_v24  ;;  %v5340_v24 = vld [vmem:[%s6458_s1 + $0x378] sm:$0xff]  }
 0x1a3   : > { %1312 = vmatprep.mubr.bf16.mxu1 %v5437_v0 }
 0x1a6   : > { %4601 = vmatmul.mubr.msk.bf16.gmra.mrb[20].mxu0 %vm354_vm3, %v5304_v25  ;;  %v5341_v25 = vld [vmem:[%s6458_s1 + $0x1a0] sm:$0xff]  }
 0x1a7   : > { %3039 = vmatprep.mubr.bf16.mxu0 %v5437_v0 }
 0x1aa   : > { %4367 = vmatmul.mubr.msk.bf16.gmra.mrb[8].mxu1 %vm354_vm3, %v5305_v26  ;;  %v5342_v26 = vld [vmem:[%s6458_s1 + $0x380] sm:$0xff]  }
 0x1ab   : > { %1322 = vmatprep.mubr.bf16.mxu1 %v5437_v0 }
 0x1ae   : > { %4602 = vmatmul.mubr.msk.bf16.gmra.mrb[24].mxu0 %vm354_vm3, %v5306_v27  ;;  %v5343_v27 = vld [vmem:[%s6458_s1 + $0x1a8] sm:$0xff]  }
 0x1af   : > { %3049 = vmatprep.mubr.bf16.mxu0 %v5437_v0 }
 0x1b2   : > { %4368 = vmatmul.mubr.msk.bf16.gmra.mrb[12].mxu1 %vm354_vm3, %v5307_v28  ;;  %v5344_v28 = vld [vmem:[%s6458_s1 + $0x388] sm:$0xff]  }
 0x1b3   : > { %1332 = vmatprep.mubr.bf16.mxu1 %v5437_v0 }
 0x1b6   : > { %4603 = vmatmul.mubr.msk.bf16.gmra.mrb[28].mxu0 %vm354_vm3, %v5308_v29  ;;  %v5345_v29 = vld [vmem:[%s6458_s1 + $0x1b0] sm:$0xff]  }
 0x1b7   : > { %3220 = vmatprep.mubr.bf16.mxu0 %v5437_v0 }
 0x1ba   : > { %4369 = vmatmul.mubr.msk.bf16.gmra.mrb[16].mxu1 %vm354_vm3, %v5309_v31  ;;  %v5347_v31 = vld [vmem:[%s6458_s1 + $0x1b8] sm:$0xff]  }
 0x1bb   : > { %1342 = vmatprep.mubr.bf16.mxu1 %v5437_v0 }
 0x1be   : > { %4629 = vmatmul.mubr.msk.bf16.vlgmr.msra.gmra.mrb[0].mxu0 %vm354_vm3, %v5310_v33  ;;  %v5349_v33 = vld [vmem:[%s6458_s1 + $0x1e0] sm:$0xff]  }
 0x1bf   : > { %3430 = vmatpush1.bf16.msra.mxu0 %v3424_v36  ;;  %3230 = vmatprep.mubr.bf16.mxu0 %v5437_v0  ;;  %v5352_v36 = vld [vmem:[%s6458_s1 + $0x3a8] sm:$0xff]  }
 0x1c0   : > { %4694 = vmatprep.subr.msk.bf16.mxu0 %vm379_vm1, %v3639_v37  ;;  %v5353_v37 = vld [vmem:[%s6458_s1 + $0x1f0] sm:$0xff]  }
 0x1c2   : > { %4370 = vmatmul.mubr.msk.bf16.gmra.mrb[20].mxu1 %vm354_vm3, %v5311_v38  ;;  %v5354_v38 = vld [vmem:[%s6458_s1 + $0x3b0] sm:$0xff]  }
 0x1c3   : > { %1352 = vmatprep.mubr.bf16.mxu1 %v5437_v0 }
 0x1c6   : > { %4630 = vmatmul.mubr.msk.bf16.gmra.mrb[4].mxu0 %vm354_vm3, %v5312_v39  ;;  %v5355_v39 = vld [vmem:[%s6458_s1 + $0x1f8] sm:$0xff]  }
 0x1c7   : > { %3240 = vmatprep.mubr.bf16.mxu0 %v5437_v0 }
 0x1ca   : > { %4371 = vmatmul.mubr.msk.bf16.gmra.mrb[24].mxu1 %vm354_vm3, %v5313_v40  ;;  %v5356_v40 = vld [vmem:[%s6458_s1 + $0x3b8] sm:$0xff]  }
 0x1cb   : > { %1362 = vmatprep.mubr.bf16.mxu1 %v5437_v0 }
 0x1ce   : > { %4631 = vmatmul.mubr.msk.bf16.gmra.mrb[8].mxu0 %vm354_vm3, %v5314_v41 }
 0x1cf   : > { %3250 = vmatprep.mubr.bf16.mxu0 %v5437_v0 }
 0x1d2   : > { %4372 = vmatmul.mubr.msk.bf16.gmra.mrb[28].mxu1 %vm354_vm3, %v5315_v42 }
 0x1d3   : > { %1533 = vmatprep.mubr.bf16.mxu1 %v5437_v0 }
 0x1d6   : > { %4632 = vmatmul.mubr.msk.bf16.gmra.mrb[12].mxu0 %vm354_vm3, %v5316_v43 }
 0x1d7   : > { %3260 = vmatprep.mubr.bf16.mxu0 %v5437_v0 }
 0x1da   : > { %4398 = vmatmul.mubr.msk.bf16.vlgmr.msra.gmra.mrb[0].mxu1 %vm354_vm3, %v5317_v45 }
 0x1db   : > { %1743 = vmatpush1.bf16.msra.mxu1 %v1737_v46  ;;  %1543 = vmatprep.mubr.bf16.mxu1 %v5437_v0 }
 0x1dc   : > { %4709 = vmatprep.subr.msk.bf16.mxu1 %vm379_vm1, %v5582_v15  ;;  %v5321_v15 = vld [vmem:[%s6458_s1 + $0x150] sm:$0xff]   ;;  %v3839_v61 = vpop.permute.xlu1 %3838 }
 0x1de   : > { %4633 = vmatmul.mubr.msk.bf16.gmra.mrb[16].mxu0 %vm354_vm3, %v5318_v47 }
 0x1df   : > { %3270 = vmatprep.mubr.bf16.mxu0 %v5437_v0 }
 0x1e2   : > { %4399 = vmatmul.mubr.msk.bf16.gmra.mrb[4].mxu1 %vm354_vm3, %v5319_v48 }
 0x1e3   : > { %1553 = vmatprep.mubr.bf16.mxu1 %v5437_v0 }
 0x1e6   : > { %4634 = vmatmul.mubr.msk.bf16.gmra.mrb[20].mxu0 %vm354_vm3, %v5320_v49  ;;  %v3844_v17 = vpop.permute.xlu1 %3843 }
 0x1e7   : > { %3280 = vmatprep.mubr.bf16.mxu0 %v5437_v0 }
 0x1ea   : > { %4400 = vmatmul.mubr.msk.bf16.gmra.mrb[8].mxu1 %vm354_vm3, %v5321_v15 }
 0x1eb   : > { %1563 = vmatprep.mubr.bf16.mxu1 %v5437_v0 }
 0x1ee   : > { %4635 = vmatmul.mubr.msk.bf16.gmra.mrb[24].mxu0 %vm354_vm3, %v5322_v50 }
 0x1ef   : > { %3290 = vmatprep.mubr.bf16.mxu0 %v5437_v0 }
 0x1f2   : > { %4401 = vmatmul.mubr.msk.bf16.gmra.mrb[12].mxu1 %vm354_vm3, %v5323_v51 }
 0x1f3   : > { %1573 = vmatprep.mubr.bf16.mxu1 %v5437_v0 }
 0x1f6   : > { %4636 = vmatmul.mubr.msk.bf16.gmra.mrb[28].mxu0 %vm354_vm3, %v5324_v52 }
 0x1f7   : > { %3461 = vmatprep.mubr.bf16.mxu0 %v5437_v0 }
 0x1fa   : > { %4402 = vmatmul.mubr.msk.bf16.gmra.mrb[16].mxu1 %vm354_vm3, %v5325_v53 }
 0x1fb   : > { %1583 = vmatprep.mubr.bf16.mxu1 %v5437_v0 }
 0x1fe   : > { %4662 = vmatmul.mubr.msk.bf16.vlgmr.msra.gmra.mrb[0].mxu0 %vm354_vm3, %v5326_v59 }
 0x1ff   : > { %3671 = vmatpush1.bf16.msra.mxu0 %v3665_v60  ;;  %3471 = vmatprep.mubr.bf16.mxu0 %v5437_v0 }
 0x202   : > { %4403 = vmatmul.mubr.msk.bf16.gmra.mrb[20].mxu1 %vm354_vm3, %v5327_v63 }
 0x203   : > { %1593 = vmatprep.mubr.bf16.mxu1 %v5437_v0 }
 0x206   : > { %4663 = vmatmul.mubr.msk.bf16.gmra.mrb[4].mxu0 %vm354_vm3, %v5328_v6 }
 0x207   : > { %3481 = vmatprep.mubr.bf16.mxu0 %v5437_v0 }
 0x20a   : > { %4404 = vmatmul.mubr.msk.bf16.gmra.mrb[24].mxu1 %vm354_vm3, %v5329_v9 }
 0x20b   : > { %1603 = vmatprep.mubr.bf16.mxu1 %v5437_v0 }
 0x20e   : > { %4664 = vmatmul.mubr.msk.bf16.gmra.mrb[8].mxu0 %vm354_vm3, %v5330_v12 }
 0x20f   : > { %3491 = vmatprep.mubr.bf16.mxu0 %v5437_v0 }
 0x212   : > { %4405 = vmatmul.mubr.msk.bf16.gmra.mrb[28].mxu1 %vm354_vm3, %v5331_v16 }
 0x213   : > { %1774 = vmatprep.mubr.bf16.mxu1 %v5437_v0 }
 0x216   : > { %4665 = vmatmul.mubr.msk.bf16.gmra.mrb[12].mxu0 %vm354_vm3, %v5332_v20 }
 0x217   : > { %3501 = vmatprep.mubr.bf16.mxu0 %v5437_v0 }
 0x21a   : > { %4431 = vmatmul.mubr.msk.bf16.vlgmr.msra.gmra.mrb[0].mxu1 %vm354_vm3, %v5333_v21 }
 0x21b   : > { %4710 = vmatpush1.bf16.msra.mxu1 %v5590_v18  ;;  %1784 = vmatprep.mubr.bf16.mxu1 %v5437_v0  ;;  %v5337_v18 = vld [vmem:[%s6458_s1 + $0x190] sm:$0xff]  }
 0x21e   : > { %4666 = vmatmul.mubr.msk.bf16.gmra.mrb[16].mxu0 %vm354_vm3, %v5334_v3 }
 0x21f   : > { %3511 = vmatprep.mubr.bf16.mxu0 %v5437_v0 }
 0x222   : > { %4432 = vmatmul.mubr.msk.bf16.gmra.mrb[4].mxu1 %vm354_vm3, %v5335_v4 }
 0x223   : > { %1794 = vmatprep.mubr.bf16.mxu1 %v5437_v0 }
 0x226   : > { %4667 = vmatmul.mubr.msk.bf16.gmra.mrb[20].mxu0 %vm354_vm3, %v5336_v1 }
 0x227   : > { %3521 = vmatprep.mubr.bf16.mxu0 %v5437_v0 }
 0x22a   : > { %4433 = vmatmul.mubr.msk.bf16.gmra.mrb[8].mxu1 %vm354_vm3, %v5337_v18 }
 0x22b   : > { %1804 = vmatprep.mubr.bf16.mxu1 %v5437_v0 }
 0x22e   : > { %4668 = vmatmul.mubr.msk.bf16.gmra.mrb[24].mxu0 %vm354_vm3, %v5338_v22 }
 0x22f   : > { %3531 = vmatprep.mubr.bf16.mxu0 %v5437_v0 }
 0x232   : > { %4434 = vmatmul.mubr.msk.bf16.gmra.mrb[12].mxu1 %vm354_vm3, %v5339_v23 }
 0x233   : > { %1814 = vmatprep.mubr.bf16.mxu1 %v5437_v0 }
 0x236   : > { %4669 = vmatmul.mubr.msk.bf16.gmra.mrb[28].mxu0 %vm354_vm3, %v5340_v24 }
 0x237   : > { %3702 = vmatprep.mubr.bf16.mxu0 %v5437_v0 }
 0x23a   : > { %4435 = vmatmul.mubr.msk.bf16.gmra.mrb[16].mxu1 %vm354_vm3, %v5341_v25 }
 0x23b   : > { %1824 = vmatprep.mubr.bf16.mxu1 %v5437_v0 }
 0x23e   : > { %4695 = vmatmul.mubr.msk.bf16.vlgmr.msra.gmra.mrb[0].mxu0 %vm354_vm3, %v5342_v26  ;;  %v3849_v26 = vpop.permute.xlu0 %3848 }
 0x23f   : > { %3712 = vmatprep.mubr.bf16.mxu0 %v5437_v0 }
 0x242   : > { %4436 = vmatmul.mubr.msk.bf16.gmra.mrb[20].mxu1 %vm354_vm3, %v5343_v27 }
 0x243   : > { %1834 = vmatprep.mubr.bf16.mxu1 %v5437_v0 }
 0x246   : > { %4696 = vmatmul.mubr.msk.bf16.gmra.mrb[4].mxu0 %vm354_vm3, %v5344_v28 }
 0x247   : > { %3722 = vmatprep.mubr.bf16.mxu0 %v5437_v0 }
 0x24a   : > { %4437 = vmatmul.mubr.msk.bf16.gmra.mrb[24].mxu1 %vm354_vm3, %v5345_v29 }
 0x24b   : > { %1844 = vmatprep.mubr.bf16.mxu1 %v5437_v0 }
 0x24e   : > { %4697 = vmatmul.mubr.msk.bf16.gmra.mrb[8].mxu0 %vm354_vm3, %v5346_v30 }
 0x24f   : > { %3732 = vmatprep.mubr.bf16.mxu0 %v5437_v0 }
 0x252   : > { %4438 = vmatmul.mubr.msk.bf16.gmra.mrb[28].mxu1 %vm354_vm3, %v5347_v31 }
 0x253   : > { %2055 = vmatprep.mubr.bf16.mxu1 %v5437_v0 }
 0x256   : > { %4698 = vmatmul.mubr.msk.bf16.gmra.mrb[12].mxu0 %vm354_vm3, %v5348_v32 }
 0x257   : > { %3742 = vmatprep.mubr.bf16.mxu0 %v5437_v0 }
 0x25a   : > { %4468 = vmatmul.mubr.msk.bf16.vlgmr.msra.gmra.mrb[16].mxu1 %vm354_vm3, %v5349_v33 }
 0x25b   : > { %2065 = vmatprep.mubr.bf16.mxu1 %v5437_v0 }
 0x25e   : > { %4699 = vmatmul.mubr.msk.bf16.gmra.mrb[16].mxu0 %vm354_vm3, %v5350_v34 }
 0x25f   : > { %3752 = vmatprep.mubr.bf16.mxu0 %v5437_v0 }
 0x262   : > { %4469 = vmatmul.mubr.msk.bf16.gmra.mrb[20].mxu1 %vm354_vm3, %v5351_v35 }
 0x263   : > { %2075 = vmatprep.mubr.bf16.mxu1 %v5437_v0 }
 0x266   : > { %4700 = vmatmul.mubr.msk.bf16.gmra.mrb[20].mxu0 %vm354_vm3, %v5352_v36 }
 0x267   : > { %3762 = vmatprep.mubr.bf16.mxu0 %v5437_v0 }
 0x26a   : > { %4470 = vmatmul.mubr.msk.bf16.gmra.mrb[24].mxu1 %vm354_vm3, %v5353_v37 }
 0x26b   : > { %2085 = vmatprep.mubr.bf16.mxu1 %v5437_v0 }
 0x26e   : > { %4701 = vmatmul.mubr.msk.bf16.gmra.mrb[24].mxu0 %vm354_vm3, %v5354_v38 }
 0x26f   : > { %3772 = vmatprep.mubr.bf16.mxu0 %v5437_v0 }
 0x272   : > { %4471 = vmatmul.mubr.msk.bf16.gmra.mrb[28].mxu1 %vm354_vm3, %v5355_v39 }
 0x276   : > { %4702 = vmatmul.mubr.msk.bf16.gmra.mrb[28].mxu0 %vm354_vm3, %v5356_v40 }
 0x2ed   : > { %v1776_v41 = vpop.f32.mrb[0].mxu1 }
 0x2ee   : > { %v1778_v42 = vpop.f32.mrb[1].mxu1 }
 0x2ef   : > { %v1780_v43 = vpop.f32.mrb[2].mxu1 }
 0x2f0   : > { %v1782_v44 = vpop.f32.mrb[3].mxu1 }
 0x2f5   : > { %v1786_v45 = vpop.f32.mrb[4].mxu1 }
 0x2f6   : > { %v1788_v46 = vpop.f32.mrb[5].mxu1 }
 0x2f7   : > { %v1790_v47 = vpop.f32.mrb[6].mxu1 }
 0x2f8   : > { %v1792_v48 = vpop.f32.mrb[7].mxu1 }
 0x2fd   : > { %v6339_v49 = vpop.f32.mrb[8].mxu1 }
 0x2fe   : > { %v6341_v0 = vpop.f32.mrb[9].mxu1 }
 0x2ff   : > { %v6343_v15 = vpop.f32.mrb[10].mxu1 }
 0x300   : > { %v6345_v50 = vpop.f32.mrb[11].mxu1 }
 0x305   : > { %v6347_v51 = vpop.f32.mrb[12].mxu1 }
 0x306   : > { %v6349_v52 = vpop.f32.mrb[13].mxu1 }
 0x307   : > { %v6351_v53 = vpop.f32.mrb[14].mxu1 }
 0x308   : > { %v6353_v54 = vpop.f32.mrb[15].mxu1 }
 0x311   : > { %v3704_v55 = vpop.f32.mrb[0].mxu0 }
 0x312   : > { %v4711_v57 = vadd.f32 %v3704_v55, %v1776_v41  ;;  %v3706_v58 = vpop.f32.mrb[1].mxu0  ;;  %v3854_v41 = vpop.permute.xlu1 %3853 }
 0x313   : > { %v4712_v59 = vadd.f32 %v3706_v58, %v1778_v42  ;;  %v3708_v60 = vpop.f32.mrb[2].mxu0 }
 0x314   : > { %v4713_v62 = vadd.f32 %v3708_v60, %v1780_v43  ;;  %v3911_v63 = vadd.f32 %v4711_v57, %v3834_v56  ;;  %v3710_v2 = vpop.f32.mrb[3].mxu0 }
 0x315   : > { %v3912_v5 = vadd.f32 %v4712_v59, %v3834_v56  ;;  %v4714_v6 = vadd.f32 %v3710_v2, %v1782_v44 }
 0x316   : > { %vm3943_vm0 = vcmp.ge.f32.partialorder %v3911_v63, 0.0  ;;  %v3975_v7 = vmul.f32 0.1, %v3911_v63  ;;  %v3913_v8 = vadd.f32 %v4713_v62, %v3839_v61  ;;  %v3864_v2 = vpop.permute.xlu1 %3863 }
 0x317   : > { %vm3944_vm1 = vcmp.ge.f32.partialorder %v3912_v5, 0.0  ;;  %v3976_v9 = vmul.f32 0.1, %v3912_v5  ;;  %v3914_v10 = vadd.f32 %v4714_v6, %v3839_v61 }
 0x318   : > { %v4007_v11 = vsel %vm3943_vm0, %v3911_v63, %v3975_v7  ;;  %vm3945_vm2 = vcmp.ge.f32.partialorder %v3913_v8, 0.0  ;;  %v3977_v12 = vmul.f32 0.1, %v3913_v8 }
 0x319   : > { %v4008_v13 = vsel %vm3944_vm1, %v3912_v5, %v3976_v9  ;;  %4039 = vst [vmem:[%s6358_s30] sm:$0xff] %v4007_v11  ;;  %vm3946_vm3 = vcmp.ge.f32.partialorder %v3914_v10, 0.0  ;;  %v3978_v14 = vmul.f32 0.1, %v3914_v10  ;;  %v3714_v16 = vpop.f32.mrb[4].mxu0 }
 0x31a   : > { %4040 = vst [vmem:[%s6358_s30 + $0x8] sm:$0xff] %v4008_v13  ;;  %v4009_v19 = vsel %vm3945_vm2, %v3913_v8, %v3977_v12  ;;  %v4715_v20 = vadd.f32 %v3714_v16, %v1786_v45  ;;  %v3716_v21 = vpop.f32.mrb[5].mxu0 }
 0x31b   : > { %v4010_v3 = vsel %vm3946_vm3, %v3914_v10, %v3978_v14  ;;  %4041 = vst [vmem:[%s6358_s30 + $0x10] sm:$0xff] %v4009_v19  ;;  %v4716_v4 = vadd.f32 %v3716_v21, %v1788_v46  ;;  %v3718_v1 = vpop.f32.mrb[6].mxu0 }
 0x31c   : > { %4042 = vst [vmem:[%s6358_s30 + $0x18] sm:$0xff] %v4010_v3  ;;  %v3915_v18 = vadd.f32 %v4715_v20, %v3844_v17  ;;  %v4717_v22 = vadd.f32 %v3718_v1, %v1790_v47  ;;  %v3720_v23 = vpop.f32.mrb[7].mxu0  ;;  %v3859_v47 = vpop.permute.xlu0 %3858 }
 0x31d   : > { %v3916_v24 = vadd.f32 %v4716_v4, %v3844_v17  ;;  %v4718_v25 = vadd.f32 %v3720_v23, %v1792_v48  ;;  %v3874_v23 = vpop.permute.xlu1 %3873 }
 0x31e   : > { %vm3947_vm4 = vcmp.ge.f32.partialorder %v3915_v18, 0.0  ;;  %v3979_v27 = vmul.f32 0.1, %v3915_v18  ;;  %v3917_v28 = vadd.f32 %v4717_v22, %v3849_v26 }
 0x31f   : > { %vm3948_vm5 = vcmp.ge.f32.partialorder %v3916_v24, 0.0  ;;  %v3980_v29 = vmul.f32 0.1, %v3916_v24  ;;  %v3918_v30 = vadd.f32 %v4718_v25, %v3849_v26 }
 0x320   : > { %v4011_v31 = vsel %vm3947_vm4, %v3915_v18, %v3979_v27  ;;  %vm3949_vm6 = vcmp.ge.f32.partialorder %v3917_v28, 0.0  ;;  %v3981_v32 = vmul.f32 0.1, %v3917_v28  ;;  %v3869_v10 = vpop.permute.xlu0 %3868 }
 0x321   : > { %v4012_v33 = vsel %vm3948_vm5, %v3916_v24, %v3980_v29  ;;  %4043 = vst [vmem:[%s6358_s30 + $0x20] sm:$0xff] %v4011_v31  ;;  %vm3950_vm7 = vcmp.ge.f32.partialorder %v3918_v30, 0.0  ;;  %v3982_v34 = vmul.f32 0.1, %v3918_v30  ;;  %v3724_v35 = vpop.f32.mrb[8].mxu0 }
 0x322   : > { %4044 = vst [vmem:[%s6358_s30 + $0x28] sm:$0xff] %v4012_v33  ;;  %v4013_v36 = vsel %vm3949_vm6, %v3917_v28, %v3981_v32  ;;  %v4719_v37 = vadd.f32 %v3724_v35, %v6339_v49  ;;  %v3726_v38 = vpop.f32.mrb[9].mxu0 }
 0x323   : > { %v4014_v39 = vsel %vm3950_vm7, %v3918_v30, %v3982_v34  ;;  %4045 = vst [vmem:[%s6358_s30 + $0x30] sm:$0xff] %v4013_v36  ;;  %v4720_v40 = vadd.f32 %v3726_v38, %v6341_v0  ;;  %v3728_v42 = vpop.f32.mrb[10].mxu0 }
 0x324   : > { %4046 = vst [vmem:[%s6358_s30 + $0x38] sm:$0xff] %v4014_v39  ;;  %v3919_v43 = vadd.f32 %v4719_v37, %v3854_v41  ;;  %v4721_v44 = vadd.f32 %v3728_v42, %v6343_v15  ;;  %v3730_v45 = vpop.f32.mrb[11].mxu0  ;;  %v3879_v30 = vpop.permute.xlu0 %3878 }
 0x325   : > { %v3920_v46 = vadd.f32 %v4720_v40, %v3854_v41  ;;  %v4722_v48 = vadd.f32 %v3730_v45, %v6345_v50 }
 0x326   : > { %vm3951_vm8 = vcmp.ge.f32.partialorder %v3919_v43, 0.0  ;;  %v3983_v49 = vmul.f32 0.1, %v3919_v43  ;;  %v3921_v55 = vadd.f32 %v4721_v44, %v3859_v47 }
 0x327   : > { %vm3952_vm9 = vcmp.ge.f32.partialorder %v3920_v46, 0.0  ;;  %v3984_v56 = vmul.f32 0.1, %v3920_v46  ;;  %v3922_v0 = vadd.f32 %v4722_v48, %v3859_v47 }
 0x328   : > { %v4015_v57 = vsel %vm3951_vm8, %v3919_v43, %v3983_v49  ;;  %vm3953_vm10 = vcmp.ge.f32.partialorder %v3921_v55, 0.0  ;;  %v3985_v58 = vmul.f32 0.1, %v3921_v55  ;;  %v3884_v49 = vpop.permute.xlu1 %3883 }
 0x329   : > { %v4016_v59 = vsel %vm3952_vm9, %v3920_v46, %v3984_v56  ;;  %4047 = vst [vmem:[%s6358_s30 + $0x40] sm:$0xff] %v4015_v57  ;;  %vm3954_vm11 = vcmp.ge.f32.partialorder %v3922_v0, 0.0  ;;  %v3986_v15 = vmul.f32 0.1, %v3922_v0  ;;  %v3734_v60 = vpop.f32.mrb[12].mxu0 }
 0x32a   : > { %4048 = vst [vmem:[%s6358_s30 + $0x48] sm:$0xff] %v4016_v59  ;;  %v4017_v61 = vsel %vm3953_vm10, %v3921_v55, %v3985_v58  ;;  %v4723_v50 = vadd.f32 %v3734_v60, %v6347_v51  ;;  %v3736_v62 = vpop.f32.mrb[13].mxu0 }
 0x32b   : > { %4049 = vst [vmem:[%s6358_s30 + $0x50] sm:$0xff] %v4017_v61  ;;  %v4018_v63 = vsel %vm3954_vm11, %v3922_v0, %v3986_v15  ;;  %v4724_v5 = vadd.f32 %v3736_v62, %v6349_v52  ;;  %v3738_v6 = vpop.f32.mrb[14].mxu0  ;;  %v3889_v15 = vpop.permute.xlu0 %3888 }
 0x32c   : > { %4050 = vst [vmem:[%s6358_s30 + $0x58] sm:$0xff] %v4018_v63  ;;  %v3923_v7 = vadd.f32 %v4723_v50, %v3864_v2  ;;  %v4725_v8 = vadd.f32 %v3738_v6, %v6351_v53  ;;  %v3740_v9 = vpop.f32.mrb[15].mxu0 }
 0x32d   : > { %v3924_v11 = vadd.f32 %v4724_v5, %v3864_v2  ;;  %v4726_v12 = vadd.f32 %v3740_v9, %v6353_v54  ;;  %v2057_v13 = vpop.f32.mrb[16].mxu1 }
 0x32e   : > { %vm3955_vm12 = vcmp.ge.f32.partialorder %v3923_v7, 0.0  ;;  %v3987_v51 = vmul.f32 0.1, %v3923_v7  ;;  %v3925_v14 = vadd.f32 %v4725_v8, %v3869_v10  ;;  %v2059_v16 = vpop.f32.mrb[17].mxu1 }
 0x32f   : > { %vm3956_vm13 = vcmp.ge.f32.partialorder %v3924_v11, 0.0  ;;  %v3988_v17 = vmul.f32 0.1, %v3924_v11  ;;  %v3926_v52 = vadd.f32 %v4726_v12, %v3869_v10  ;;  %v2061_v19 = vpop.f32.mrb[18].mxu1 }
 0x330   : > { %v4019_v20 = vsel %vm3955_vm12, %v3923_v7, %v3987_v51  ;;  %vm3957_vm14 = vcmp.ge.f32.partialorder %v3925_v14, 0.0  ;;  %v3989_v53 = vmul.f32 0.1, %v3925_v14  ;;  %v2063_v21 = vpop.f32.mrb[19].mxu1 }
 0x331   : > { %4051 = vst [vmem:[%s6358_s30 + $0x60] sm:$0xff] %v4019_v20  ;;  %v4020_v3 = vsel %vm3956_vm13, %v3924_v11, %v3988_v17  ;;  %vm3958_vm15 = vcmp.ge.f32.partialorder %v3926_v52, 0.0  ;;  %v3990_v54 = vmul.f32 0.1, %v3926_v52  ;;  %v3744_v4 = vpop.f32.mrb[16].mxu0  ;;  %v3894_v17 = vpop.permute.xlu1 %3893 }
 0x332   : > { %4052 = vst [vmem:[%s6358_s30 + $0x68] sm:$0xff] %v4020_v3  ;;  %v4021_v1 = vsel %vm3957_vm14, %v3925_v14, %v3989_v53  ;;  %v4727_v18 = vadd.f32 %v3744_v4, %v2057_v13  ;;  %v3746_v22 = vpop.f32.mrb[17].mxu0 }
 0x333   : > { %4053 = vst [vmem:[%s6358_s30 + $0x70] sm:$0xff] %v4021_v1  ;;  %v4022_v24 = vsel %vm3958_vm15, %v3926_v52, %v3990_v54  ;;  %v4728_v25 = vadd.f32 %v3746_v22, %v2059_v16  ;;  %v3748_v26 = vpop.f32.mrb[18].mxu0  ;;  %v3899_v54 = vpop.permute.xlu0 %3898 }
 0x334   : > { %4054 = vst [vmem:[%s6358_s30 + $0x78] sm:$0xff] %v4022_v24  ;;  %v3927_v27 = vadd.f32 %v4727_v18, %v3874_v23  ;;  %v4729_v28 = vadd.f32 %v3748_v26, %v2061_v19  ;;  %v3750_v29 = vpop.f32.mrb[19].mxu0 }
 0x335   : > { %v3928_v31 = vadd.f32 %v4728_v25, %v3874_v23  ;;  %v4730_v32 = vadd.f32 %v3750_v29, %v2063_v21  ;;  %v2067_v33 = vpop.f32.mrb[20].mxu1 }
 0x336   : > { %vm3959_vm0 = vcmp.ge.f32.partialorder %v3927_v27, 0.0  ;;  %v3991_v34 = vmul.f32 0.1, %v3927_v27  ;;  %v3929_v35 = vadd.f32 %v4729_v28, %v3879_v30  ;;  %v2069_v36 = vpop.f32.mrb[21].mxu1 }
 0x337   : > { %vm3960_vm1 = vcmp.ge.f32.partialorder %v3928_v31, 0.0  ;;  %v3992_v37 = vmul.f32 0.1, %v3928_v31  ;;  %v3930_v38 = vadd.f32 %v4730_v32, %v3879_v30  ;;  %v2071_v39 = vpop.f32.mrb[22].mxu1 }
 0x338   : > { %v4023_v40 = vsel %vm3959_vm0, %v3927_v27, %v3991_v34  ;;  %vm3961_vm2 = vcmp.ge.f32.partialorder %v3929_v35, 0.0  ;;  %v3993_v41 = vmul.f32 0.1, %v3929_v35  ;;  %v2073_v42 = vpop.f32.mrb[23].mxu1 }
 0x339   : > { %4055 = vst [vmem:[%s6358_s30 + $0x80] sm:$0xff] %v4023_v40  ;;  %v4024_v43 = vsel %vm3960_vm1, %v3928_v31, %v3992_v37  ;;  %vm3962_vm3 = vcmp.ge.f32.partialorder %v3930_v38, 0.0  ;;  %v3994_v44 = vmul.f32 0.1, %v3930_v38  ;;  %v3754_v45 = vpop.f32.mrb[20].mxu0  ;;  %v3904_v37 = vpop.permute.xlu1 %3903 }
 0x33a   : > { %4056 = vst [vmem:[%s6358_s30 + $0x88] sm:$0xff] %v4024_v43  ;;  %v4025_v46 = vsel %vm3961_vm2, %v3929_v35, %v3993_v41  ;;  %v4731_v47 = vadd.f32 %v3754_v45, %v2067_v33  ;;  %v3756_v48 = vpop.f32.mrb[21].mxu0 }
 0x33b   : > { %4057 = vst [vmem:[%s6358_s30 + $0x90] sm:$0xff] %v4025_v46  ;;  %v4026_v55 = vsel %vm3962_vm3, %v3930_v38, %v3994_v44  ;;  %v4732_v56 = vadd.f32 %v3756_v48, %v2069_v36  ;;  %v3758_v0 = vpop.f32.mrb[22].mxu0  ;;  %v3909_v44 = vpop.permute.xlu0 %3908 }
 0x33c   : > { %4058 = vst [vmem:[%s6358_s30 + $0x98] sm:$0xff] %v4026_v55  ;;  %v3931_v57 = vadd.f32 %v4731_v47, %v3884_v49  ;;  %v4733_v58 = vadd.f32 %v3758_v0, %v2071_v39  ;;  %v3760_v59 = vpop.f32.mrb[23].mxu0 }
 0x33d   : > { %v3932_v60 = vadd.f32 %v4732_v56, %v3884_v49  ;;  %v4734_v61 = vadd.f32 %v3760_v59, %v2073_v42  ;;  %v2077_v50 = vpop.f32.mrb[24].mxu1 }
 0x33e   : > { %vm3963_vm4 = vcmp.ge.f32.partialorder %v3931_v57, 0.0  ;;  %v3995_v62 = vmul.f32 0.1, %v3931_v57  ;;  %v3933_v63 = vadd.f32 %v4733_v58, %v3889_v15  ;;  %v2079_v2 = vpop.f32.mrb[25].mxu1 }
 0x33f   : > { %vm3964_vm5 = vcmp.ge.f32.partialorder %v3932_v60, 0.0  ;;  %v3996_v5 = vmul.f32 0.1, %v3932_v60  ;;  %v3934_v6 = vadd.f32 %v4734_v61, %v3889_v15  ;;  %v2081_v7 = vpop.f32.mrb[26].mxu1 }
 0x340   : > { %v4027_v8 = vsel %vm3963_vm4, %v3931_v57, %v3995_v62  ;;  %vm3965_vm6 = vcmp.ge.f32.partialorder %v3933_v63, 0.0  ;;  %v3997_v9 = vmul.f32 0.1, %v3933_v63  ;;  %v2083_v10 = vpop.f32.mrb[27].mxu1 }
 0x341   : > { %4059 = vst [vmem:[%s6358_s30 + $0xa0] sm:$0xff] %v4027_v8  ;;  %v4028_v11 = vsel %vm3964_vm5, %v3932_v60, %v3996_v5  ;;  %vm3966_vm7 = vcmp.ge.f32.partialorder %v3934_v6, 0.0  ;;  %v3998_v12 = vmul.f32 0.1, %v3934_v6  ;;  %v3764_v13 = vpop.f32.mrb[24].mxu0 }
 0x342   : > { %4060 = vst [vmem:[%s6358_s30 + $0xa8] sm:$0xff] %v4028_v11  ;;  %v4029_v51 = vsel %vm3965_vm6, %v3933_v63, %v3997_v9  ;;  %v4735_v14 = vadd.f32 %v3764_v13, %v2077_v50  ;;  %v3766_v16 = vpop.f32.mrb[25].mxu0 }
 0x343   : > { %4061 = vst [vmem:[%s6358_s30 + $0xb0] sm:$0xff] %v4029_v51  ;;  %v4030_v52 = vsel %vm3966_vm7, %v3934_v6, %v3998_v12  ;;  %v4736_v19 = vadd.f32 %v3766_v16, %v2079_v2  ;;  %v3768_v20 = vpop.f32.mrb[26].mxu0 }
 0x344   : > { %4062 = vst [vmem:[%s6358_s30 + $0xb8] sm:$0xff] %v4030_v52  ;;  %v3935_v53 = vadd.f32 %v4735_v14, %v3894_v17  ;;  %v4737_v21 = vadd.f32 %v3768_v20, %v2081_v7  ;;  %v3770_v3 = vpop.f32.mrb[27].mxu0 }
 0x345   : > { %v3936_v4 = vadd.f32 %v4736_v19, %v3894_v17  ;;  %v4738_v1 = vadd.f32 %v3770_v3, %v2083_v10  ;;  %v2087_v18 = vpop.f32.mrb[28].mxu1 }
 0x346   : > { %vm3967_vm8 = vcmp.ge.f32.partialorder %v3935_v53, 0.0  ;;  %v3999_v22 = vmul.f32 0.1, %v3935_v53  ;;  %v3937_v23 = vadd.f32 %v4737_v21, %v3899_v54  ;;  %v2089_v24 = vpop.f32.mrb[29].mxu1 }
 0x347   : > { %vm3968_vm9 = vcmp.ge.f32.partialorder %v3936_v4, 0.0  ;;  %v4000_v25 = vmul.f32 0.1, %v3936_v4  ;;  %v3938_v26 = vadd.f32 %v4738_v1, %v3899_v54  ;;  %v2091_v27 = vpop.f32.mrb[30].mxu1 }
 0x348   : > { %v4031_v28 = vsel %vm3967_vm8, %v3935_v53, %v3999_v22  ;;  %vm3969_vm10 = vcmp.ge.f32.partialorder %v3937_v23, 0.0  ;;  %v4001_v29 = vmul.f32 0.1, %v3937_v23  ;;  %v2093_v30 = vpop.f32.mrb[31].mxu1 }
 0x349   : > { %4063 = vst [vmem:[%s6358_s30 + $0xc0] sm:$0xff] %v4031_v28  ;;  %v4032_v31 = vsel %vm3968_vm9, %v3936_v4, %v4000_v25  ;;  %vm3970_vm11 = vcmp.ge.f32.partialorder %v3938_v26, 0.0  ;;  %v4002_v32 = vmul.f32 0.1, %v3938_v26  ;;  %v3774_v33 = vpop.f32.mrb[28].mxu0 }
 0x34a   : > { %4064 = vst [vmem:[%s6358_s30 + $0xc8] sm:$0xff] %v4032_v31  ;;  %v4033_v34 = vsel %vm3969_vm10, %v3937_v23, %v4001_v29  ;;  %v4739_v35 = vadd.f32 %v3774_v33, %v2087_v18  ;;  %v3776_v36 = vpop.f32.mrb[29].mxu0 }
 0x34b   : > { %4065 = vst [vmem:[%s6358_s30 + $0xd0] sm:$0xff] %v4033_v34  ;;  %v4034_v38 = vsel %vm3970_vm11, %v3938_v26, %v4002_v32  ;;  %v4740_v39 = vadd.f32 %v3776_v36, %v2089_v24  ;;  %v3778_v40 = vpop.f32.mrb[30].mxu0 }
 0x34c   : > { %4066 = vst [vmem:[%s6358_s30 + $0xd8] sm:$0xff] %v4034_v38  ;;  %v3939_v41 = vadd.f32 %v4739_v35, %v3904_v37  ;;  %v4741_v42 = vadd.f32 %v3778_v40, %v2091_v27  ;;  %v3780_v43 = vpop.f32.mrb[31].mxu0 }
 0x34d   : > { %v3940_v45 = vadd.f32 %v4740_v39, %v3904_v37  ;;  %v4742_v46 = vadd.f32 %v3780_v43, %v2093_v30 }
 0x34e   : > { %vm3971_vm12 = vcmp.ge.f32.partialorder %v3939_v41, 0.0  ;;  %v4003_v47 = vmul.f32 0.1, %v3939_v41  ;;  %v3941_v48 = vadd.f32 %v4741_v42, %v3909_v44 }
 0x34f   : > { %vm3972_vm13 = vcmp.ge.f32.partialorder %v3940_v45, 0.0  ;;  %v4004_v49 = vmul.f32 0.1, %v3940_v45  ;;  %v3942_v55 = vadd.f32 %v4742_v46, %v3909_v44 }
 0x350   : > { %v4035_v56 = vsel %vm3971_vm12, %v3939_v41, %v4003_v47  ;;  %vm3973_vm14 = vcmp.ge.f32.partialorder %v3941_v48, 0.0  ;;  %v4005_v0 = vmul.f32 0.1, %v3941_v48 }
 0x351   : > { %4067 = vst [vmem:[%s6358_s30 + $0xe0] sm:$0xff] %v4035_v56  ;;  %v4036_v57 = vsel %vm3972_vm13, %v3940_v45, %v4004_v49  ;;  %vm3974_vm15 = vcmp.ge.f32.partialorder %v3942_v55, 0.0  ;;  %v4006_v58 = vmul.f32 0.1, %v3942_v55 }
 0x352   : > { %4068 = vst [vmem:[%s6358_s30 + $0xe8] sm:$0xff] %v4036_v57  ;;  %v4037_v59 = vsel %vm3973_vm14, %v3941_v48, %v4005_v0 }
 0x353   : > { %4069 = vst [vmem:[%s6358_s30 + $0xf0] sm:$0xff] %v4037_v59  ;;  %v4038_v15 = vsel %vm3974_vm15, %v3942_v55, %v4006_v58 }
 0x354   : > { %4070 = vst [vmem:[%s6358_s30 + $0xf8] sm:$0xff] %v4038_v15 }
 0x355   : > { %5370 = shalt.err (!%p5367_p5)
}
 0x356   : > { %s5371_s19 = scalar_lea.hbm %s6402_s8, 4096  ;;  %s5375_s26 = scalar_lea.hbm %s6460_s3, 8192 }
 0x357   : > { %p5372_p6 = scmp.ne.s32.totalorder %s6402_s8, %s5371_s19  ;;  %p5376_p10 = scmp.lt.u32.totalorder %s6402_s8, %s6460_s3 }
 0x358   : > { %p5377_p11 = scmp.lt.u32.totalorder %s5375_s26, %s5371_s19  ;;  %p5379_p13 = scmp.lt.u32.totalorder %s5371_s19, %s6402_s8 }
 0x359   : > { %p5373_p7 = pnand %p5372_p6, %p5515_p4 }
 0x35a   : > { %p5378_p12 = por %p5377_p11, %p5376_p10 }
 0x35b   : > { %p5374_p9 = pneg %p5373_p7 }
 0x35c   : > { %p5380_p0 = por %p5379_p13, %p5378_p12 }
 0x35e   : > { %p5381_p1 = pnand %p5380_p0, %p5374_p9 }
 0x360   : > { %5384 = shalt.err (!%p5381_p1)
}
 0x361   : > { %s5453_s29 = smov 256   ;;  %s5454_s30 = smov 16  }
 0x362   : > { %5160 = dma.vmem_to_hbm [thread:$0]  (%p5515_p4), %s6404_s5, 4096, %s6402_s8, %s6411_s15, %s5453_s29, %s5453_s29, %s5454_s30  }
 0x363 PF: > { %p5166_p2 = scmp.ge.s32.totalorder %s5435_s17, 2  ;;  %s4104_s4 = sand.u32 1, %s5415_s12  }
 0x364   : > { %s4105_s6 = scalar_lea.sflag [#allocation3], %s4104_s4 }
 0x365   : > { %p5163_p3 = pnand %p5166_p2, %p5522_p8 }
 0x367   : > { %5410 = dma.done.wait (!%p5163_p3), %s4105_s6, 4096  }
 0x368   : > { %5412 = vsyncadd (!%p5163_p3), %s4105_s6, 4294963200  ;;  %s16_s17 = sadd.s32 1, %s5435_s17   ;;  %s6463_s12 = smov %s5419_s13 }
 0x369   : > { %p13_p5 = scmp.ge.s32.totalorder %s16_s17, 4   ;;  %s6464_s13 = smov %s5423_s14 }
 0x36a   : > { %s6465_s14 = smov %s5528_s25  ;;  %s6466_s15 = smov %s5431_s16 }
 0x36b   : > { %s6467_s16 = smov %s6469_s20  ;;  %15 = sbr.rel (!%p13_p5) target bundleno = 4 (0x4), region = 87 }
 0x372   :  { %4110 = vsyncpa [#allocation3], 1 }
 0x373   :  { %4112 = vsyncpa [#allocation3 + $0x1], 1 }

</bundles_post_ra>
